<compile_context>
chip_gen: v5e
topology: v5e:2x2
jax: 0.10.0
libtpu: 0.0.40
codegen_flags: <defaults>
</compile_context>

<pallas_src>
import functools

import jax
import jax.numpy as jnp
from jax.experimental import pallas as pl
from jax.experimental.pallas import tpu as pltpu


def _round_up(n, m):
    return ((n + m - 1) // m) * m


# --------------------------------------------------------------------------
# Fused single-stage TCN kernel (one batch element per grid step)
# --------------------------------------------------------------------------
def _stage_kernel(x_ref, w_in_ref, b_in_ref, wd_ref, bd_ref, wp_ref, bp_ref,
                  w_out_ref, b_out_ref, o_ref, act_ref, *, dilations, T, P):
    """x_ref:(1,T,Dp)  w_in:(Dp,Fp)  wd:(3L,Fp,Fp)  wp:(L,Fp,Fp)  w_out:(Fp,Cp)
    act_ref:(T+2P,Fp) VMEM scratch; rows [P,P+T) hold the activation, the
    P-row halos stay zero and provide the dilated-conv zero padding."""
    f32 = jnp.float32

    # Zero the scratch once per grid step -> zero halo for the dilated taps.
    act_ref[...] = jnp.zeros(act_ref.shape, f32)

    # in 1x1 conv: (T, Dp) @ (Dp, Fp)
    x = x_ref[0]
    out = jnp.dot(x, w_in_ref[...], preferred_element_type=f32) + b_in_ref[...]
    act_ref[pl.ds(P, T), :] = out

    # Dilated residual layers; loop unrolled at trace time (dilations static).
    for li, d in enumerate(dilations):
        center = act_ref[pl.ds(P, T), :]
        prev = act_ref[pl.ds(P - d, T), :]      # x[t - d] (zeros in the halo)
        nxt = act_ref[pl.ds(P + d, T), :]       # x[t + d] (zeros in the halo)
        h = (jnp.dot(prev, wd_ref[3 * li + 0], preferred_element_type=f32)
             + jnp.dot(center, wd_ref[3 * li + 1], preferred_element_type=f32)
             + jnp.dot(nxt, wd_ref[3 * li + 2], preferred_element_type=f32)
             + bd_ref[li])
        h = jnp.maximum(h, 0.0)                 # ReLU
        # 1x1 conv + dropout(identity at inference) + residual add
        new = (center
               + jnp.dot(h, wp_ref[li], preferred_element_type=f32)
               + bp_ref[li])
        act_ref[pl.ds(P, T), :] = new

    # out 1x1 conv: (T, Fp) @ (Fp, Cp)
    final = act_ref[pl.ds(P, T), :]
    o_ref[0] = (jnp.dot(final, w_out_ref[...], preferred_element_type=f32)
                + b_out_ref[...])


# --------------------------------------------------------------------------
# Parameter init (deterministic, PyTorch-like uniform fan-in init)
# --------------------------------------------------------------------------
def _init_conv1d(key, out_c, in_c, ksize):
    k1, k2 = jax.random.split(key)
    bound = 1.0 / float((in_c * ksize) ** 0.5)
    w = jax.random.uniform(k1, (out_c, in_c, ksize), minval=-bound,
                           maxval=bound, dtype=jnp.float32)
    b = jax.random.uniform(k2, (out_c,), minval=-bound, maxval=bound,
                           dtype=jnp.float32)
    return w, b


def init_single_stage_params(key, num_layers, num_f_maps, dim, num_classes):
    ks = jax.random.split(key, 2 * num_layers + 2)
    p = {}
    p["in_w"], p["in_b"] = _init_conv1d(ks[0], num_f_maps, dim, 1)
    layers = []
    for i in range(num_layers):
        dw, db = _init_conv1d(ks[1 + 2 * i], num_f_maps, num_f_maps, 3)
        pw, pb = _init_conv1d(ks[2 + 2 * i], num_f_maps, num_f_maps, 1)
        layers.append({"dw": dw, "db": db, "pw": pw, "pb": pb})
    p["layers"] = layers
    p["out_w"], p["out_b"] = _init_conv1d(ks[-1], num_classes, num_f_maps, 1)
    # SingleStageModel.conv2 (Conv2d(512,4,1)) is unused in forward() -> skipped.
    return p


# --------------------------------------------------------------------------
# Weight packing (zero-pad to lane-dense 128-wide matmul layout)
# --------------------------------------------------------------------------
def _pad2(a, r, c):
    out = jnp.zeros((r, c), jnp.float32)
    return out.at[:a.shape[0], :a.shape[1]].set(a.astype(jnp.float32))


def _pack_stage(params, num_layers, num_f_maps, Dp, Fp, Cp):
    F = num_f_maps
    w_in = _pad2(params["in_w"][:, :, 0].T, Dp, Fp)            # (dim,F)->(Dp,Fp)
    b_in = _pad2(params["in_b"][None, :], 1, Fp)
    wd = jnp.zeros((3 * num_layers, Fp, Fp), jnp.float32)
    bd = jnp.zeros((num_layers, 1, Fp), jnp.float32)
    wp = jnp.zeros((num_layers, Fp, Fp), jnp.float32)
    bp = jnp.zeros((num_layers, 1, Fp), jnp.float32)
    for i, lyr in enumerate(params["layers"]):
        for k in range(3):
            wd = wd.at[3 * i + k, :F, :F].set(lyr["dw"][:, :, k].T)
        bd = bd.at[i, 0, :F].set(lyr["db"])
        wp = wp.at[i, :F, :F].set(lyr["pw"][:, :, 0].T)
        bp = bp.at[i, 0, :F].set(lyr["pb"])
    w_out = _pad2(params["out_w"][:, :, 0].T, Fp, Cp)           # (F,C)->(Fp,Cp)
    b_out = _pad2(params["out_b"][None, :], 1, Cp)
    return w_in, b_in, wd, bd, wp, bp, w_out, b_out


# --------------------------------------------------------------------------
# Forward pass
# --------------------------------------------------------------------------
def single_stage_forward(params, x, *, num_layers, num_f_maps, num_classes):
    """x: (B, dim, T) float32 -> (B, num_classes, T), matching PyTorch."""
    B, dim, T = x.shape
    Dp = _round_up(dim, 128)
    Fp = _round_up(num_f_maps, 128)
    Cp = _round_up(num_classes, 128)
    dilations = tuple(2 ** i for i in range(num_layers))        # static ints
    P = max(8, _round_up(max(dilations), 8))                    # halo rows

    # (B, dim, T) -> lane-dense (B, T, Dp) with zero-padded channels.
    x_tc = jnp.transpose(x, (0, 2, 1)).astype(jnp.float32)
    x_pad = jnp.zeros((B, T, Dp), jnp.float32).at[:, :, :dim].set(x_tc)

    w_in, b_in, wd, bd, wp, bp, w_out, b_out = _pack_stage(
        params, num_layers, num_f_maps, Dp, Fp, Cp)

    L = num_layers
    kern = functools.partial(_stage_kernel, dilations=dilations, T=T, P=P)
    out_pad = pl.pallas_call(
        kern,
        out_shape=jax.ShapeDtypeStruct((B, T, Cp), jnp.float32),
        grid=(B,),
        in_specs=[
            pl.BlockSpec((1, T, Dp), lambda b: (b, 0, 0)),       # x
            pl.BlockSpec((Dp, Fp), lambda b: (0, 0)),            # w_in
            pl.BlockSpec((1, Fp), lambda b: (0, 0)),             # b_in
            pl.BlockSpec((3 * L, Fp, Fp), lambda b: (0, 0, 0)),  # wd
            pl.BlockSpec((L, 1, Fp), lambda b: (0, 0, 0)),       # bd
            pl.BlockSpec((L, Fp, Fp), lambda b: (0, 0, 0)),      # wp
            pl.BlockSpec((L, 1, Fp), lambda b: (0, 0, 0)),       # bp
            pl.BlockSpec((Fp, Cp), lambda b: (0, 0)),            # w_out
            pl.BlockSpec((1, Cp), lambda b: (0, 0)),             # b_out
        ],
        out_specs=pl.BlockSpec((1, T, Cp), lambda b: (b, 0, 0)),
        scratch_shapes=[pltpu.VMEM((T + 2 * P, Fp), jnp.float32)],
        compiler_params=pltpu.CompilerParams(
            dimension_semantics=("parallel",)),
    )(x_pad, w_in, b_in, wd, bd, wp, bp, w_out, b_out)

    # Drop the zero-padded class lanes and return PyTorch layout (B, C, T).
    return jnp.transpose(out_pad[:, :, :num_classes], (0, 2, 1))


# --------------------------------------------------------------------------
# Pure-JAX reference (for a tolerance check)
# --------------------------------------------------------------------------
def reference_forward(params, x, num_layers, num_f_maps, num_classes):
    hi = jax.lax.Precision.HIGHEST
    T = x.shape[2]
    out = jnp.einsum("fd,bdt->bft", params["in_w"][:, :, 0], x, precision=hi)
    out = out + params["in_b"][None, :, None]
    for i, lyr in enumerate(params["layers"]):
        d = 2 ** i
        xp = jnp.pad(out, ((0, 0), (0, 0), (d, d)))
        h = sum(jnp.einsum("oi,bit->bot", lyr["dw"][:, :, k],
                           xp[:, :, k * d:k * d + T], precision=hi)
                for k in range(3))
        h = jax.nn.relu(h + lyr["db"][None, :, None])
        out = out + jnp.einsum("oi,bit->bot", lyr["pw"][:, :, 0], h,
                               precision=hi) + lyr["pb"][None, :, None]
    out = jnp.einsum("cf,bft->bct", params["out_w"][:, :, 0], out,
                     precision=hi) + params["out_b"][None, :, None]
    return out


# --------------------------------------------------------------------------
# Main
# --------------------------------------------------------------------------
if __name__ == "__main__":
    # SingleStageModel(num_layers=3, num_f_maps=32, dim=64, num_classes=6)
    num_layers, num_f_maps, dim, num_classes = 3, 32, 64, 6
    B, T = 2, 128

    key = jax.random.PRNGKey(0)
    kp, kx = jax.random.split(key)
    params = init_single_stage_params(kp, num_layers, num_f_maps, dim,
                                      num_classes)
    x = jax.random.normal(kx, (B, dim, T), dtype=jnp.float32)

    fwd = jax.jit(functools.partial(single_stage_forward,
                                    num_layers=num_layers,
                                    num_f_maps=num_f_maps,
                                    num_classes=num_classes))
    out = fwd(params, x)
    jax.block_until_ready(out)

    assert out.shape == (B, num_classes, T), out.shape
    assert bool(jnp.all(jnp.isfinite(out)))

    ref = reference_forward(params, x, num_layers, num_f_maps, num_classes)
    err = float(jnp.max(jnp.abs(out - ref)))
    assert err < 1e-2, f"max abs err {err}"

    print("KERNEL_OK")
</pallas_src>

<mosaic_0001>
module attributes {stable_mosaic.version = 11 : i64} {
  func.func @_stage_kernel(%arg0: i32, %arg1: memref<1x128x128xf32, #tpu.memory_space<vmem>>, %arg2: memref<128x128xf32, #tpu.memory_space<vmem>>, %arg3: memref<1x128xf32, #tpu.memory_space<vmem>>, %arg4: memref<9x128x128xf32, #tpu.memory_space<vmem>>, %arg5: memref<3x1x128xf32, #tpu.memory_space<vmem>>, %arg6: memref<3x128x128xf32, #tpu.memory_space<vmem>>, %arg7: memref<3x1x128xf32, #tpu.memory_space<vmem>>, %arg8: memref<128x128xf32, #tpu.memory_space<vmem>>, %arg9: memref<1x128xf32, #tpu.memory_space<vmem>>, %arg10: memref<1x128x128xf32, #tpu.memory_space<vmem>>, %arg11: memref<144x128xf32, #tpu.memory_space<vmem>>) attributes {dimension_semantics = [#tpu.dimension_semantics<parallel>], iteration_bounds = array<i64: 2>, scalar_prefetch = 0 : i64, scratch_operands = 1 : i64, tpu.core_type = #tpu.core_type<tc>, window_params = [{transform_indices = @transform_0, window_bounds = array<i64: 1, 128, 128>}, {pipeline_mode = #tpu.pipeline_mode<synchronous>, transform_indices = @transform_1, window_bounds = array<i64: 128, 128>}, {pipeline_mode = #tpu.pipeline_mode<synchronous>, transform_indices = @transform_2, window_bounds = array<i64: 1, 128>}, {pipeline_mode = #tpu.pipeline_mode<synchronous>, transform_indices = @transform_3, window_bounds = array<i64: 9, 128, 128>}, {pipeline_mode = #tpu.pipeline_mode<synchronous>, transform_indices = @transform_4, window_bounds = array<i64: 3, 1, 128>}, {pipeline_mode = #tpu.pipeline_mode<synchronous>, transform_indices = @transform_5, window_bounds = array<i64: 3, 128, 128>}, {pipeline_mode = #tpu.pipeline_mode<synchronous>, transform_indices = @transform_6, window_bounds = array<i64: 3, 1, 128>}, {pipeline_mode = #tpu.pipeline_mode<synchronous>, transform_indices = @transform_7, window_bounds = array<i64: 128, 128>}, {pipeline_mode = #tpu.pipeline_mode<synchronous>, transform_indices = @transform_8, window_bounds = array<i64: 1, 128>}, {transform_indices = @transform_9, window_bounds = array<i64: 1, 128, 128>}]} {
    %cst = arith.constant 0.000000e+00 : f32
    %0 = vector.broadcast %cst : f32 to vector<144x128xf32>
    %c0 = arith.constant 0 : index
    %c0_0 = arith.constant 0 : index
    %1 = vector.load %arg11[%c0, %c0_0] : memref<144x128xf32, #tpu.memory_space<vmem>>, vector<144x128xf32>
    tpu.vector_store %arg11[%c0, %c0_0], %0 {strides = array<i32>} : memref<144x128xf32, #tpu.memory_space<vmem>>, vector<144x128xf32>,
    %c0_1 = arith.constant 0 : index
    %c0_2 = arith.constant 0 : index
    %c0_3 = arith.constant 0 : index
    %2 = vector.load %arg1[%c0_1, %c0_2, %c0_3] : memref<1x128x128xf32, #tpu.memory_space<vmem>>, vector<1x128x128xf32>
    %3 = vector.shape_cast %2 : vector<1x128x128xf32> to vector<128x128xf32>
    %c0_4 = arith.constant 0 : index
    %c0_5 = arith.constant 0 : index
    %4 = vector.load %arg2[%c0_4, %c0_5] : memref<128x128xf32, #tpu.memory_space<vmem>>, vector<128x128xf32>
    %cst_6 = arith.constant dense<0.000000e+00> : vector<128x128xf32>
    %5 = tpu.matmul %3, %4, %cst_6 {dimension_numbers = #tpu.dot_dimension_numbers<[1], [0], [0], [1], [0, 0, 1, 1], [], []>} : vector<128x128xf32>, vector<128x128xf32>, vector<128x128xf32> -> vector<128x128xf32>
    %c0_7 = arith.constant 0 : index
    %c0_8 = arith.constant 0 : index
    %6 = vector.load %arg3[%c0_7, %c0_8] : memref<1x128xf32, #tpu.memory_space<vmem>>, vector<1x128xf32>
    %7 = vector.broadcast %6 : vector<1x128xf32> to vector<128x128xf32>
    %8 = arith.addf %5, %7 : vector<128x128xf32>
    %c8 = arith.constant 8 : index
    %c0_9 = arith.constant 0 : index
    %9 = vector.load %arg11[%c8, %c0_9] : memref<144x128xf32, #tpu.memory_space<vmem>>, vector<128x128xf32>
    tpu.vector_store %arg11[%c8, %c0_9], %8 {strides = array<i32>} : memref<144x128xf32, #tpu.memory_space<vmem>>, vector<128x128xf32>,
    %c8_10 = arith.constant 8 : index
    %c0_11 = arith.constant 0 : index
    %10 = vector.load %arg11[%c8_10, %c0_11] : memref<144x128xf32, #tpu.memory_space<vmem>>, vector<128x128xf32>
    %c7 = arith.constant 7 : index
    %c0_12 = arith.constant 0 : index
    %11 = vector.load %arg11[%c7, %c0_12] : memref<144x128xf32, #tpu.memory_space<vmem>>, vector<128x128xf32>
    %c9 = arith.constant 9 : index
    %c0_13 = arith.constant 0 : index
    %12 = vector.load %arg11[%c9, %c0_13] : memref<144x128xf32, #tpu.memory_space<vmem>>, vector<128x128xf32>
    %c0_14 = arith.constant 0 : index
    %c0_15 = arith.constant 0 : index
    %c0_16 = arith.constant 0 : index
    %13 = vector.load %arg4[%c0_14, %c0_15, %c0_16] : memref<9x128x128xf32, #tpu.memory_space<vmem>>, vector<1x128x128xf32>
    %14 = vector.shape_cast %13 : vector<1x128x128xf32> to vector<128x128xf32>
    %cst_17 = arith.constant dense<0.000000e+00> : vector<128x128xf32>
    %15 = tpu.matmul %11, %14, %cst_17 {dimension_numbers = #tpu.dot_dimension_numbers<[1], [0], [0], [1], [0, 0, 1, 1], [], []>} : vector<128x128xf32>, vector<128x128xf32>, vector<128x128xf32> -> vector<128x128xf32>
    %c1 = arith.constant 1 : index
    %c0_18 = arith.constant 0 : index
    %c0_19 = arith.constant 0 : index
    %16 = vector.load %arg4[%c1, %c0_18, %c0_19] : memref<9x128x128xf32, #tpu.memory_space<vmem>>, vector<1x128x128xf32>
    %17 = vector.shape_cast %16 : vector<1x128x128xf32> to vector<128x128xf32>
    %cst_20 = arith.constant dense<0.000000e+00> : vector<128x128xf32>
    %18 = tpu.matmul %10, %17, %cst_20 {dimension_numbers = #tpu.dot_dimension_numbers<[1], [0], [0], [1], [0, 0, 1, 1], [], []>} : vector<128x128xf32>, vector<128x128xf32>, vector<128x128xf32> -> vector<128x128xf32>
    %19 = arith.addf %15, %18 : vector<128x128xf32>
    %c2 = arith.constant 2 : index
    %c0_21 = arith.constant 0 : index
    %c0_22 = arith.constant 0 : index
    %20 = vector.load %arg4[%c2, %c0_21, %c0_22] : memref<9x128x128xf32, #tpu.memory_space<vmem>>, vector<1x128x128xf32>
    %21 = vector.shape_cast %20 : vector<1x128x128xf32> to vector<128x128xf32>
    %cst_23 = arith.constant dense<0.000000e+00> : vector<128x128xf32>
    %22 = tpu.matmul %12, %21, %cst_23 {dimension_numbers = #tpu.dot_dimension_numbers<[1], [0], [0], [1], [0, 0, 1, 1], [], []>} : vector<128x128xf32>, vector<128x128xf32>, vector<128x128xf32> -> vector<128x128xf32>
    %23 = arith.addf %19, %22 : vector<128x128xf32>
    %c0_24 = arith.constant 0 : index
    %c0_25 = arith.constant 0 : index
    %c0_26 = arith.constant 0 : index
    %24 = vector.load %arg5[%c0_24, %c0_25, %c0_26] : memref<3x1x128xf32, #tpu.memory_space<vmem>>, vector<1x1x128xf32>
    %25 = vector.shape_cast %24 : vector<1x1x128xf32> to vector<1x128xf32>
    %26 = vector.broadcast %25 : vector<1x128xf32> to vector<128x128xf32>
    %27 = arith.addf %23, %26 : vector<128x128xf32>
    %cst_27 = arith.constant 0.000000e+00 : f32
    %28 = vector.broadcast %cst_27 : f32 to vector<128x128xf32>
    %29 = arith.maximumf %27, %28 : vector<128x128xf32>
    %c0_28 = arith.constant 0 : index
    %c0_29 = arith.constant 0 : index
    %c0_30 = arith.constant 0 : index
    %30 = vector.load %arg6[%c0_28, %c0_29, %c0_30] : memref<3x128x128xf32, #tpu.memory_space<vmem>>, vector<1x128x128xf32>
    %31 = vector.shape_cast %30 : vector<1x128x128xf32> to vector<128x128xf32>
    %cst_31 = arith.constant dense<0.000000e+00> : vector<128x128xf32>
    %32 = tpu.matmul %29, %31, %cst_31 {dimension_numbers = #tpu.dot_dimension_numbers<[1], [0], [0], [1], [0, 0, 1, 1], [], []>} : vector<128x128xf32>, vector<128x128xf32>, vector<128x128xf32> -> vector<128x128xf32>
    %33 = arith.addf %10, %32 : vector<128x128xf32>
    %c0_32 = arith.constant 0 : index
    %c0_33 = arith.constant 0 : index
    %c0_34 = arith.constant 0 : index
    %34 = vector.load %arg7[%c0_32, %c0_33, %c0_34] : memref<3x1x128xf32, #tpu.memory_space<vmem>>, vector<1x1x128xf32>
    %35 = vector.shape_cast %34 : vector<1x1x128xf32> to vector<1x128xf32>
    %36 = vector.broadcast %35 : vector<1x128xf32> to vector<128x128xf32>
    %37 = arith.addf %33, %36 : vector<128x128xf32>
    %c8_35 = arith.constant 8 : index
    %c0_36 = arith.constant 0 : index
    %38 = vector.load %arg11[%c8_35, %c0_36] : memref<144x128xf32, #tpu.memory_space<vmem>>, vector<128x128xf32>
    tpu.vector_store %arg11[%c8_35, %c0_36], %37 {strides = array<i32>} : memref<144x128xf32, #tpu.memory_space<vmem>>, vector<128x128xf32>,
    %c8_37 = arith.constant 8 : index
    %c0_38 = arith.constant 0 : index
    %39 = vector.load %arg11[%c8_37, %c0_38] : memref<144x128xf32, #tpu.memory_space<vmem>>, vector<128x128xf32>
    %c6 = arith.constant 6 : index
    %c0_39 = arith.constant 0 : index
    %40 = vector.load %arg11[%c6, %c0_39] : memref<144x128xf32, #tpu.memory_space<vmem>>, vector<128x128xf32>
    %c10 = arith.constant 10 : index
    %c0_40 = arith.constant 0 : index
    %41 = vector.load %arg11[%c10, %c0_40] : memref<144x128xf32, #tpu.memory_space<vmem>>, vector<128x128xf32>
    %c3 = arith.constant 3 : index
    %c0_41 = arith.constant 0 : index
    %c0_42 = arith.constant 0 : index
    %42 = vector.load %arg4[%c3, %c0_41, %c0_42] : memref<9x128x128xf32, #tpu.memory_space<vmem>>, vector<1x128x128xf32>
    %43 = vector.shape_cast %42 : vector<1x128x128xf32> to vector<128x128xf32>
    %cst_43 = arith.constant dense<0.000000e+00> : vector<128x128xf32>
    %44 = tpu.matmul %40, %43, %cst_43 {dimension_numbers = #tpu.dot_dimension_numbers<[1], [0], [0], [1], [0, 0, 1, 1], [], []>} : vector<128x128xf32>, vector<128x128xf32>, vector<128x128xf32> -> vector<128x128xf32>
    %c4 = arith.constant 4 : index
    %c0_44 = arith.constant 0 : index
    %c0_45 = arith.constant 0 : index
    %45 = vector.load %arg4[%c4, %c0_44, %c0_45] : memref<9x128x128xf32, #tpu.memory_space<vmem>>, vector<1x128x128xf32>
    %46 = vector.shape_cast %45 : vector<1x128x128xf32> to vector<128x128xf32>
    %cst_46 = arith.constant dense<0.000000e+00> : vector<128x128xf32>
    %47 = tpu.matmul %39, %46, %cst_46 {dimension_numbers = #tpu.dot_dimension_numbers<[1], [0], [0], [1], [0, 0, 1, 1], [], []>} : vector<128x128xf32>, vector<128x128xf32>, vector<128x128xf32> -> vector<128x128xf32>
    %48 = arith.addf %44, %47 : vector<128x128xf32>
    %c5 = arith.constant 5 : index
    %c0_47 = arith.constant 0 : index
    %c0_48 = arith.constant 0 : index
    %49 = vector.load %arg4[%c5, %c0_47, %c0_48] : memref<9x128x128xf32, #tpu.memory_space<vmem>>, vector<1x128x128xf32>
    %50 = vector.shape_cast %49 : vector<1x128x128xf32> to vector<128x128xf32>
    %cst_49 = arith.constant dense<0.000000e+00> : vector<128x128xf32>
    %51 = tpu.matmul %41, %50, %cst_49 {dimension_numbers = #tpu.dot_dimension_numbers<[1], [0], [0], [1], [0, 0, 1, 1], [], []>} : vector<128x128xf32>, vector<128x128xf32>, vector<128x128xf32> -> vector<128x128xf32>
    %52 = arith.addf %48, %51 : vector<128x128xf32>
    %c1_50 = arith.constant 1 : index
    %c0_51 = arith.constant 0 : index
    %c0_52 = arith.constant 0 : index
    %53 = vector.load %arg5[%c1_50, %c0_51, %c0_52] : memref<3x1x128xf32, #tpu.memory_space<vmem>>, vector<1x1x128xf32>
    %54 = vector.shape_cast %53 : vector<1x1x128xf32> to vector<1x128xf32>
    %55 = vector.broadcast %54 : vector<1x128xf32> to vector<128x128xf32>
    %56 = arith.addf %52, %55 : vector<128x128xf32>
    %cst_53 = arith.constant 0.000000e+00 : f32
    %57 = vector.broadcast %cst_53 : f32 to vector<128x128xf32>
    %58 = arith.maximumf %56, %57 : vector<128x128xf32>
    %c1_54 = arith.constant 1 : index
    %c0_55 = arith.constant 0 : index
    %c0_56 = arith.constant 0 : index
    %59 = vector.load %arg6[%c1_54, %c0_55, %c0_56] : memref<3x128x128xf32, #tpu.memory_space<vmem>>, vector<1x128x128xf32>
    %60 = vector.shape_cast %59 : vector<1x128x128xf32> to vector<128x128xf32>
    %cst_57 = arith.constant dense<0.000000e+00> : vector<128x128xf32>
    %61 = tpu.matmul %58, %60, %cst_57 {dimension_numbers = #tpu.dot_dimension_numbers<[1], [0], [0], [1], [0, 0, 1, 1], [], []>} : vector<128x128xf32>, vector<128x128xf32>, vector<128x128xf32> -> vector<128x128xf32>
    %62 = arith.addf %39, %61 : vector<128x128xf32>
    %c1_58 = arith.constant 1 : index
    %c0_59 = arith.constant 0 : index
    %c0_60 = arith.constant 0 : index
    %63 = vector.load %arg7[%c1_58, %c0_59, %c0_60] : memref<3x1x128xf32, #tpu.memory_space<vmem>>, vector<1x1x128xf32>
    %64 = vector.shape_cast %63 : vector<1x1x128xf32> to vector<1x128xf32>
    %65 = vector.broadcast %64 : vector<1x128xf32> to vector<128x128xf32>
    %66 = arith.addf %62, %65 : vector<128x128xf32>
    %c8_61 = arith.constant 8 : index
    %c0_62 = arith.constant 0 : index
    %67 = vector.load %arg11[%c8_61, %c0_62] : memref<144x128xf32, #tpu.memory_space<vmem>>, vector<128x128xf32>
    tpu.vector_store %arg11[%c8_61, %c0_62], %66 {strides = array<i32>} : memref<144x128xf32, #tpu.memory_space<vmem>>, vector<128x128xf32>,
    %c8_63 = arith.constant 8 : index
    %c0_64 = arith.constant 0 : index
    %68 = vector.load %arg11[%c8_63, %c0_64] : memref<144x128xf32, #tpu.memory_space<vmem>>, vector<128x128xf32>
    %c4_65 = arith.constant 4 : index
    %c0_66 = arith.constant 0 : index
    %69 = vector.load %arg11[%c4_65, %c0_66] : memref<144x128xf32, #tpu.memory_space<vmem>>, vector<128x128xf32>
    %c12 = arith.constant 12 : index
    %c0_67 = arith.constant 0 : index
    %70 = vector.load %arg11[%c12, %c0_67] : memref<144x128xf32, #tpu.memory_space<vmem>>, vector<128x128xf32>
    %c6_68 = arith.constant 6 : index
    %c0_69 = arith.constant 0 : index
    %c0_70 = arith.constant 0 : index
    %71 = vector.load %arg4[%c6_68, %c0_69, %c0_70] : memref<9x128x128xf32, #tpu.memory_space<vmem>>, vector<1x128x128xf32>
    %72 = vector.shape_cast %71 : vector<1x128x128xf32> to vector<128x128xf32>
    %cst_71 = arith.constant dense<0.000000e+00> : vector<128x128xf32>
    %73 = tpu.matmul %69, %72, %cst_71 {dimension_numbers = #tpu.dot_dimension_numbers<[1], [0], [0], [1], [0, 0, 1, 1], [], []>} : vector<128x128xf32>, vector<128x128xf32>, vector<128x128xf32> -> vector<128x128xf32>
    %c7_72 = arith.constant 7 : index
    %c0_73 = arith.constant 0 : index
    %c0_74 = arith.constant 0 : index
    %74 = vector.load %arg4[%c7_72, %c0_73, %c0_74] : memref<9x128x128xf32, #tpu.memory_space<vmem>>, vector<1x128x128xf32>
    %75 = vector.shape_cast %74 : vector<1x128x128xf32> to vector<128x128xf32>
    %cst_75 = arith.constant dense<0.000000e+00> : vector<128x128xf32>
    %76 = tpu.matmul %68, %75, %cst_75 {dimension_numbers = #tpu.dot_dimension_numbers<[1], [0], [0], [1], [0, 0, 1, 1], [], []>} : vector<128x128xf32>, vector<128x128xf32>, vector<128x128xf32> -> vector<128x128xf32>
    %77 = arith.addf %73, %76 : vector<128x128xf32>
    %c8_76 = arith.constant 8 : index
    %c0_77 = arith.constant 0 : index
    %c0_78 = arith.constant 0 : index
    %78 = vector.load %arg4[%c8_76, %c0_77, %c0_78] : memref<9x128x128xf32, #tpu.memory_space<vmem>>, vector<1x128x128xf32>
    %79 = vector.shape_cast %78 : vector<1x128x128xf32> to vector<128x128xf32>
    %cst_79 = arith.constant dense<0.000000e+00> : vector<128x128xf32>
    %80 = tpu.matmul %70, %79, %cst_79 {dimension_numbers = #tpu.dot_dimension_numbers<[1], [0], [0], [1], [0, 0, 1, 1], [], []>} : vector<128x128xf32>, vector<128x128xf32>, vector<128x128xf32> -> vector<128x128xf32>
    %81 = arith.addf %77, %80 : vector<128x128xf32>
    %c2_80 = arith.constant 2 : index
    %c0_81 = arith.constant 0 : index
    %c0_82 = arith.constant 0 : index
    %82 = vector.load %arg5[%c2_80, %c0_81, %c0_82] : memref<3x1x128xf32, #tpu.memory_space<vmem>>, vector<1x1x128xf32>
    %83 = vector.shape_cast %82 : vector<1x1x128xf32> to vector<1x128xf32>
    %84 = vector.broadcast %83 : vector<1x128xf32> to vector<128x128xf32>
    %85 = arith.addf %81, %84 : vector<128x128xf32>
    %cst_83 = arith.constant 0.000000e+00 : f32
    %86 = vector.broadcast %cst_83 : f32 to vector<128x128xf32>
    %87 = arith.maximumf %85, %86 : vector<128x128xf32>
    %c2_84 = arith.constant 2 : index
    %c0_85 = arith.constant 0 : index
    %c0_86 = arith.constant 0 : index
    %88 = vector.load %arg6[%c2_84, %c0_85, %c0_86] : memref<3x128x128xf32, #tpu.memory_space<vmem>>, vector<1x128x128xf32>
    %89 = vector.shape_cast %88 : vector<1x128x128xf32> to vector<128x128xf32>
    %cst_87 = arith.constant dense<0.000000e+00> : vector<128x128xf32>
    %90 = tpu.matmul %87, %89, %cst_87 {dimension_numbers = #tpu.dot_dimension_numbers<[1], [0], [0], [1], [0, 0, 1, 1], [], []>} : vector<128x128xf32>, vector<128x128xf32>, vector<128x128xf32> -> vector<128x128xf32>
    %91 = arith.addf %68, %90 : vector<128x128xf32>
    %c2_88 = arith.constant 2 : index
    %c0_89 = arith.constant 0 : index
    %c0_90 = arith.constant 0 : index
    %92 = vector.load %arg7[%c2_88, %c0_89, %c0_90] : memref<3x1x128xf32, #tpu.memory_space<vmem>>, vector<1x1x128xf32>
    %93 = vector.shape_cast %92 : vector<1x1x128xf32> to vector<1x128xf32>
    %94 = vector.broadcast %93 : vector<1x128xf32> to vector<128x128xf32>
    %95 = arith.addf %91, %94 : vector<128x128xf32>
    %c8_91 = arith.constant 8 : index
    %c0_92 = arith.constant 0 : index
    %96 = vector.load %arg11[%c8_91, %c0_92] : memref<144x128xf32, #tpu.memory_space<vmem>>, vector<128x128xf32>
    tpu.vector_store %arg11[%c8_91, %c0_92], %95 {strides = array<i32>} : memref<144x128xf32, #tpu.memory_space<vmem>>, vector<128x128xf32>,
    %c8_93 = arith.constant 8 : index
    %c0_94 = arith.constant 0 : index
    %97 = vector.load %arg11[%c8_93, %c0_94] : memref<144x128xf32, #tpu.memory_space<vmem>>, vector<128x128xf32>
    %c0_95 = arith.constant 0 : index
    %c0_96 = arith.constant 0 : index
    %98 = vector.load %arg8[%c0_95, %c0_96] : memref<128x128xf32, #tpu.memory_space<vmem>>, vector<128x128xf32>
    %cst_97 = arith.constant dense<0.000000e+00> : vector<128x128xf32>
    %99 = tpu.matmul %97, %98, %cst_97 {dimension_numbers = #tpu.dot_dimension_numbers<[1], [0], [0], [1], [0, 0, 1, 1], [], []>} : vector<128x128xf32>, vector<128x128xf32>, vector<128x128xf32> -> vector<128x128xf32>
    %c0_98 = arith.constant 0 : index
    %c0_99 = arith.constant 0 : index
    %100 = vector.load %arg9[%c0_98, %c0_99] : memref<1x128xf32, #tpu.memory_space<vmem>>, vector<1x128xf32>
    %101 = vector.broadcast %100 : vector<1x128xf32> to vector<128x128xf32>
    %102 = arith.addf %99, %101 : vector<128x128xf32>
    %c0_100 = arith.constant 0 : index
    %c0_101 = arith.constant 0 : index
    %c0_102 = arith.constant 0 : index
    %103 = vector.load %arg10[%c0_100, %c0_101, %c0_102] : memref<1x128x128xf32, #tpu.memory_space<vmem>>, vector<1x128x128xf32>
    %104 = vector.shape_cast %103 : vector<1x128x128xf32> to vector<128x128xf32>
    %105 = vector.shape_cast %102 : vector<128x128xf32> to vector<1x128x128xf32>
    tpu.vector_store %arg10[%c0_100, %c0_101, %c0_102], %105 {strides = array<i32>} : memref<1x128x128xf32, #tpu.memory_space<vmem>>, vector<1x128x128xf32>,
    return
  }
  func.func @transform_0(%arg0: i32) -> (i32, i32, i32) {
    %c0_i32 = arith.constant 0 : i32
    %c0_i32_0 = arith.constant 0 : i32
    %c0_i32_1 = arith.constant 0 : i32
    return %arg0, %c0_i32, %c0_i32_0 : i32, i32, i32
  }
  func.func @transform_1(%arg0: i32) -> (i32, i32) {
    %c0_i32 = arith.constant 0 : i32
    %c0_i32_0 = arith.constant 0 : i32
    %c0_i32_1 = arith.constant 0 : i32
    return %c0_i32, %c0_i32_0 : i32, i32
  }
  func.func @transform_2(%arg0: i32) -> (i32, i32) {
    %c0_i32 = arith.constant 0 : i32
    %c0_i32_0 = arith.constant 0 : i32
    %c0_i32_1 = arith.constant 0 : i32
    return %c0_i32, %c0_i32_0 : i32, i32
  }
  func.func @transform_3(%arg0: i32) -> (i32, i32, i32) {
    %c0_i32 = arith.constant 0 : i32
    %c0_i32_0 = arith.constant 0 : i32
    %c0_i32_1 = arith.constant 0 : i32
    %c0_i32_2 = arith.constant 0 : i32
    return %c0_i32, %c0_i32_0, %c0_i32_1 : i32, i32, i32
  }
  func.func @transform_4(%arg0: i32) -> (i32, i32, i32) {
    %c0_i32 = arith.constant 0 : i32
    %c0_i32_0 = arith.constant 0 : i32
    %c0_i32_1 = arith.constant 0 : i32
    %c0_i32_2 = arith.constant 0 : i32
    return %c0_i32, %c0_i32_0, %c0_i32_1 : i32, i32, i32
  }
  func.func @transform_5(%arg0: i32) -> (i32, i32, i32) {
    %c0_i32 = arith.constant 0 : i32
    %c0_i32_0 = arith.constant 0 : i32
    %c0_i32_1 = arith.constant 0 : i32
    %c0_i32_2 = arith.constant 0 : i32
    return %c0_i32, %c0_i32_0, %c0_i32_1 : i32, i32, i32
  }
  func.func @transform_6(%arg0: i32) -> (i32, i32, i32) {
    %c0_i32 = arith.constant 0 : i32
    %c0_i32_0 = arith.constant 0 : i32
    %c0_i32_1 = arith.constant 0 : i32
    %c0_i32_2 = arith.constant 0 : i32
    return %c0_i32, %c0_i32_0, %c0_i32_1 : i32, i32, i32
  }
  func.func @transform_7(%arg0: i32) -> (i32, i32) {
    %c0_i32 = arith.constant 0 : i32
    %c0_i32_0 = arith.constant 0 : i32
    %c0_i32_1 = arith.constant 0 : i32
    return %c0_i32, %c0_i32_0 : i32, i32
  }
  func.func @transform_8(%arg0: i32) -> (i32, i32) {
    %c0_i32 = arith.constant 0 : i32
    %c0_i32_0 = arith.constant 0 : i32
    %c0_i32_1 = arith.constant 0 : i32
    return %c0_i32, %c0_i32_0 : i32, i32
  }
  func.func @transform_9(%arg0: i32) -> (i32, i32, i32) {
    %c0_i32 = arith.constant 0 : i32
    %c0_i32_0 = arith.constant 0 : i32
    %c0_i32_1 = arith.constant 0 : i32
    return %arg0, %c0_i32, %c0_i32_0 : i32, i32, i32
  }
}

</mosaic_0001>

<bundles_post_ra>
// kernel: single_stage_forward.1
= control target key start
LH: loop header
LB: loop body
LE: loop exit
PB: predicated region body
PF: predicated region fallthrough
CT: control target
= control target key end

     0   :  { %s2352_s30 = smov 0   ;;  %s3502_s0 = inlined_call_operand.vmem [shape: f32[2,128,128], index: 0, kind: input, shape index: {}]   ;;  %s3503_s1 = inlined_call_operand.vmem [shape: f32[128,128], index: 1, kind: input, shape index: {}]   ;;  %s3504_s2 = inlined_call_operand.vmem [shape: f32[1,128], index: 2, kind: input, shape index: {}]   ;;  %s3505_s3 = inlined_call_operand.vmem [shape: f32[9,128,128], index: 3, kind: input, shape index: {}]   ;;  %s3506_s4 = inlined_call_operand.vmem [shape: f32[3,1,128], index: 4, kind: input, shape index: {}]   ;;  %s3507_s5 = inlined_call_operand.vmem [shape: f32[3,128,128], index: 5, kind: input, shape index: {}]   ;;  %s3508_s6 = inlined_call_operand.vmem [shape: f32[3,1,128], index: 6, kind: input, shape index: {}]   ;;  %s3509_s7 = inlined_call_operand.vmem [shape: f32[128,128], index: 7, kind: input, shape index: {}]   ;;  %s3510_s8 = inlined_call_operand.vmem [shape: f32[1,128], index: 8, kind: input, shape index: {}]   ;;  %s3511_s9 = inlined_call_operand.vmem [shape: f32[2,128,128], index: 9, kind: output, shape index: {}]  }
   0x1 LB: > { %s2067_s10 = sadd.s32 4294967295, %s2299_s30   ;;  %p2071_p0 = scmp.ge.s32.totalorder %s2299_s30, 1  ;;  %s2299_s30 = sphi %s2352_s30, %s19_s30  }
   0x2   : > { %p287_p1 = scmp.lt.s32.totalorder %s2299_s30, 3 }
   0x4   : > { %p288_p2 = pnand %p2071_p0, %p287_p1 }
   0x5   : > { %p323_p3 = scmp.lt.s32.totalorder (!%p288_p2), %s2067_s10, 1 }
   0x6   : > { %291 = sbr.rel (%p288_p2) target bundleno = 1327 (0x52f), region = 56 }
   0xb   : > { %v382_v0 = vld [vmem:[%s3503_s1 + $0x78] sm:$0xff]  ;;  %v381_v1 = vld [vmem:[%s3503_s1 + $0x70] sm:$0xff]  ;;  %v380_v2 = vld [vmem:[%s3503_s1 + $0x68] sm:$0xff]  ;;  %s3513_s10 = smov (!%p323_p3, %s2067_s10), 1  ;;  %v2301_v28 = vmov 0.0  }
   0xc   : > { %387 = vmatpush.msra.mxu0 %v382_v0  ;;  %2244 = vmatpush.msra.mxu2 %v382_v0  ;;  %v379_v3 = vld [vmem:[%s3503_s1 + $0x60] sm:$0xff]  ;;  %v378_v4 = vld [vmem:[%s3503_s1 + $0x58] sm:$0xff]  ;;  %v377_v5 = vld [vmem:[%s3503_s1 + $0x50] sm:$0xff]  ;;  %s2242_s18 = sshll.u32 %s3513_s10, 7  ;;  %333 = vst [vmem:[#allocation2] sm:$0xff] %v2301_v28 }
   0xd   : > { %v376_v6 = vld [vmem:[%s3503_s1 + $0x48] sm:$0xff]  ;;  %v375_v7 = vld [vmem:[%s3503_s1 + $0x40] sm:$0xff]  ;;  %v374_v8 = vld [vmem:[%s3503_s1 + $0x38] sm:$0xff]  ;;  %s2417_s25 = scalar_lea.vmem %s3502_s0, %s2242_s18  ;;  %350 = vst [vmem:[#allocation2 + $0x88] sm:$0xff] %v2301_v28  ;;  %s3481_s13 = scalar_lea.vmem %s3511_s9, %s2242_s18 }
   0xe   : > { %388 = vmatpush.msra.mxu0 %v381_v1  ;;  %2245 = vmatpush.msra.mxu2 %v381_v1  ;;  %v373_v9 = vld [vmem:[%s3503_s1 + $0x30] sm:$0xff]  ;;  %v372_v10 = vld [vmem:[%s3503_s1 + $0x28] sm:$0xff]  ;;  %v371_v11 = vld [vmem:[%s3503_s1 + $0x20] sm:$0xff] }
   0xf   : > { %v370_v12 = vld [vmem:[%s3503_s1 + $0x18] sm:$0xff]  ;;  %v369_v13 = vld [vmem:[%s3503_s1 + $0x10] sm:$0xff]  ;;  %v368_v14 = vld [vmem:[%s3503_s1 + $0x8] sm:$0xff] }
  0x10   : > { %389 = vmatpush.msra.mxu0 %v380_v2  ;;  %2246 = vmatpush.msra.mxu2 %v380_v2  ;;  %v367_v15 = vld [vmem:[%s3503_s1] sm:$0xff]  ;;  %v352_v18 = vld [vmem:[%s2417_s25 + $0x8] sm:$0xff]  ;;  %v353_v20 = vld [vmem:[%s2417_s25 + $0x10] sm:$0xff] }
  0x11   : > { %v351_v16 = vld [vmem:[%s2417_s25] sm:$0xff]  ;;  %v360_v19 = vld [vmem:[%s2417_s25 + $0x48] sm:$0xff]  ;;  %v361_v21 = vld [vmem:[%s2417_s25 + $0x50] sm:$0xff] }
  0x12   : > { %390 = vmatpush.msra.mxu0 %v379_v3  ;;  %2247 = vmatpush.msra.mxu2 %v379_v3  ;;  %v359_v17 = vld [vmem:[%s2417_s25 + $0x40] sm:$0xff]  ;;  %v354_v22 = vld [vmem:[%s2417_s25 + $0x18] sm:$0xff]  ;;  %v530_v25 = vld [vmem:[%s3505_s3 + $0x70] sm:$0xff] }
  0x13   : > { %v362_v23 = vld [vmem:[%s2417_s25 + $0x58] sm:$0xff]  ;;  %v2090_v27 = vld [vmem:[%s3505_s3 + $0xf0] sm:$0xff]  ;;  %v529_v29 = vld [vmem:[%s3505_s3 + $0x68] sm:$0xff] }
  0x14   : > { %391 = vmatpush.msra.mxu0 %v378_v4  ;;  %2248 = vmatpush.msra.mxu2 %v378_v4  ;;  %v531_v24 = vld [vmem:[%s3505_s3 + $0x78] sm:$0xff]  ;;  %v2089_v30 = vld [vmem:[%s3505_s3 + $0xe8] sm:$0xff]  ;;  %v528_v31 = vld [vmem:[%s3505_s3 + $0x60] sm:$0xff] }
  0x15   : > { %v2091_v26 = vld [vmem:[%s3505_s3 + $0xf8] sm:$0xff]  ;;  %v355_v32 = vld [vmem:[%s2417_s25 + $0x20] sm:$0xff]  ;;  %v526_v36 = vld [vmem:[%s3505_s3 + $0x50] sm:$0xff] }
  0x16   : > { %392 = vmatpush.msra.mxu0 %v377_v5  ;;  %2249 = vmatpush.msra.mxu2 %v377_v5  ;;  %v363_v33 = vld [vmem:[%s2417_s25 + $0x60] sm:$0xff]  ;;  %v527_v34 = vld [vmem:[%s3505_s3 + $0x58] sm:$0xff]  ;;  %v525_v38 = vld [vmem:[%s3505_s3 + $0x48] sm:$0xff] }
  0x17   : > { %2260 = vmatpush.msra.mxu3 %v2091_v26  ;;  %549 = vmatpush.msra.mxu1 %v2091_v26  ;;  %v2088_v35 = vld [vmem:[%s3505_s3 + $0xe0] sm:$0xff]  ;;  %v2087_v37 = vld [vmem:[%s3505_s3 + $0xd8] sm:$0xff]  ;;  %v2086_v39 = vld [vmem:[%s3505_s3 + $0xd0] sm:$0xff] }
  0x18   : > { %393 = vmatpush.msra.mxu0 %v376_v6  ;;  %2250 = vmatpush.msra.mxu2 %v376_v6  ;;  %v524_v40 = vld [vmem:[%s3505_s3 + $0x40] sm:$0xff]  ;;  %v2085_v41 = vld [vmem:[%s3505_s3 + $0xc8] sm:$0xff]  ;;  %v523_v44 = vld [vmem:[%s3505_s3 + $0x38] sm:$0xff] }
  0x19   : > { %2261 = vmatpush.msra.mxu3 %v2090_v27  ;;  %550 = vmatpush.msra.mxu1 %v2090_v27  ;;  %v356_v42 = vld [vmem:[%s2417_s25 + $0x28] sm:$0xff]  ;;  %v522_v45 = vld [vmem:[%s3505_s3 + $0x30] sm:$0xff]  ;;  %v358_v48 = vld [vmem:[%s2417_s25 + $0x38] sm:$0xff] }
  0x1a   : > { %394 = vmatpush.msra.mxu0 %v375_v7  ;;  %2251 = vmatpush.msra.mxu2 %v375_v7  ;;  %v364_v43 = vld [vmem:[%s2417_s25 + $0x68] sm:$0xff]  ;;  %v357_v46 = vld [vmem:[%s2417_s25 + $0x30] sm:$0xff]  ;;  %v366_v49 = vld [vmem:[%s2417_s25 + $0x78] sm:$0xff] }
  0x1b   : > { %2262 = vmatpush.msra.mxu3 %v2089_v30  ;;  %551 = vmatpush.msra.mxu1 %v2089_v30  ;;  %v365_v47 = vld [vmem:[%s2417_s25 + $0x70] sm:$0xff]  ;;  %v2084_v50 = vld [vmem:[%s3505_s3 + $0xc0] sm:$0xff]  ;;  %v2083_v51 = vld [vmem:[%s3505_s3 + $0xb8] sm:$0xff] }
  0x1c   : > { %395 = vmatpush.msra.mxu0 %v374_v8  ;;  %2252 = vmatpush.msra.mxu2 %v374_v8  ;;  %v2082_v52 = vld [vmem:[%s3505_s3 + $0xb0] sm:$0xff]  ;;  %v2081_v53 = vld [vmem:[%s3505_s3 + $0xa8] sm:$0xff]  ;;  %v2080_v55 = vld [vmem:[%s3505_s3 + $0xa0] sm:$0xff] }
  0x1d   : > { %2263 = vmatpush.msra.mxu3 %v2088_v35  ;;  %552 = vmatpush.msra.mxu1 %v2088_v35  ;;  %v521_v54 = vld [vmem:[%s3505_s3 + $0x28] sm:$0xff]  ;;  %v520_v56 = vld [vmem:[%s3505_s3 + $0x20] sm:$0xff]  ;;  %v2079_v57 = vld [vmem:[%s3505_s3 + $0x98] sm:$0xff] }
  0x1e   : > { %396 = vmatpush.msra.mxu0 %v373_v9  ;;  %2253 = vmatpush.msra.mxu2 %v373_v9  ;;  %v519_v58 = vld [vmem:[%s3505_s3 + $0x18] sm:$0xff]  ;;  %v2078_v59 = vld [vmem:[%s3505_s3 + $0x90] sm:$0xff]  ;;  %v2077_v61 = vld [vmem:[%s3505_s3 + $0x88] sm:$0xff] }
  0x1f   : > { %2264 = vmatpush.msra.mxu3 %v2087_v37  ;;  %553 = vmatpush.msra.mxu1 %v2087_v37  ;;  %v518_v60 = vld [vmem:[%s3505_s3 + $0x10] sm:$0xff]  ;;  %v517_v62 = vld [vmem:[%s3505_s3 + $0x8] sm:$0xff]  ;;  %v2076_v63 = vld [vmem:[%s3505_s3 + $0x80] sm:$0xff] }
  0x20   : > { %397 = vmatpush.msra.mxu0 %v372_v10  ;;  %2254 = vmatpush.msra.mxu2 %v372_v10  ;;  %v516_v0 = vld [vmem:[%s3505_s3] sm:$0xff]  ;;  %v2107_v1 = vld [vmem:[%s3505_s3 + $0x178] sm:$0xff]  ;;  %v2106_v2 = vld [vmem:[%s3505_s3 + $0x170] sm:$0xff] }
  0x21   : > { %2265 = vmatpush.msra.mxu3 %v2086_v39  ;;  %554 = vmatpush.msra.mxu1 %v2086_v39  ;;  %v2105_v3 = vld [vmem:[%s3505_s3 + $0x168] sm:$0xff]  ;;  %v2104_v4 = vld [vmem:[%s3505_s3 + $0x160] sm:$0xff]  ;;  %v2103_v8 = vld [vmem:[%s3505_s3 + $0x158] sm:$0xff] }
  0x22   : > { %398 = vmatpush.msra.mxu0 %v371_v11  ;;  %2255 = vmatpush.msra.mxu2 %v371_v11  ;;  %v2549_v5 = vld [vmem:[%s3504_s2] ss:$0 sm:$0xff]  ;;  %v2102_v9 = vld [vmem:[%s3505_s3 + $0x150] sm:$0xff]  ;;  %v2095_v35 = vld [vmem:[%s3505_s3 + $0x118] sm:$0xff] }
  0x23   : > { %2266 = vmatpush.msra.mxu3 %v2085_v41  ;;  %555 = vmatpush.msra.mxu1 %v2085_v41  ;;  %v2096_v30 = vld [vmem:[%s3505_s3 + $0x120] sm:$0xff]  ;;  %v2094_v37 = vld [vmem:[%s3505_s3 + $0x110] sm:$0xff] }
  0x24   : > { %399 = vmatpush.msra.mxu0 %v370_v12  ;;  %2256 = vmatpush.msra.mxu2 %v370_v12  ;;  %v2092_v41 = vld [vmem:[%s3505_s3 + $0x100] sm:$0xff] }
  0x25   : > { %2267 = vmatpush.msra.mxu3 %v2084_v50  ;;  %556 = vmatpush.msra.mxu1 %v2084_v50 }
  0x26   : > { %400 = vmatpush.msra.mxu0 %v369_v13  ;;  %2257 = vmatpush.msra.mxu2 %v369_v13 }
  0x27   : > { %2268 = vmatpush.msra.mxu3 %v2083_v51  ;;  %557 = vmatpush.msra.mxu1 %v2083_v51 }
  0x28   : > { %401 = vmatpush.msra.mxu0 %v368_v14  ;;  %2258 = vmatpush.msra.mxu2 %v368_v14 }
  0x29   : > { %2269 = vmatpush.msra.mxu3 %v2082_v52  ;;  %558 = vmatpush.msra.mxu1 %v2082_v52 }
  0x2a   : > { %402 = vmatpush.msra.mxu0 %v367_v15  ;;  %2259 = vmatpush.msra.mxu2 %v367_v15  ;;  %v2101_v15 = vld [vmem:[%s3505_s3 + $0x148] sm:$0xff] }
  0x2b   : > { %403 = vmatmul.f32.vlgmr.msra.gmra.mxu0 %v351_v16  ;;  %427 = vmatmul.f32.vlgmr.msra.gmra.mxu2 %v359_v17  ;;  %v2100_v16 = vld [vmem:[%s3505_s3 + $0x140] sm:$0xff] }
  0x2c   : > { %614 = vmatpush.msrb.mxu2 %v531_v24  ;;  %2270 = vmatpush.msra.mxu3 %v2081_v53 }
  0x2d   : > { %559 = vmatpush.msra.mxu1 %v2081_v53 }
  0x2e   : > { %615 = vmatpush.msrb.mxu2 %v530_v25  ;;  %2271 = vmatpush.msra.mxu3 %v2080_v55 }
  0x2f   : > { %560 = vmatpush.msra.mxu1 %v2080_v55 }
  0x30   : > { %616 = vmatpush.msrb.mxu2 %v529_v29  ;;  %2272 = vmatpush.msra.mxu3 %v2079_v57  ;;  %v2097_v29 = vld [vmem:[%s3505_s3 + $0x128] sm:$0xff] }
  0x31   : > { %561 = vmatpush.msra.mxu1 %v2079_v57 }
  0x32   : > { %617 = vmatpush.msrb.mxu2 %v528_v31  ;;  %2273 = vmatpush.msra.mxu3 %v2078_v59 }
  0x33   : > { %406 = vmatmul.f32.gmra.mxu0 %v352_v18  ;;  %430 = vmatmul.f32.gmra.mxu2 %v360_v19 }
  0x34   : > { %618 = vmatpush.msrb.mxu2 %v527_v34  ;;  %562 = vmatpush.msra.mxu1 %v2078_v59 }
  0x35   : > { %2274 = vmatpush.msra.mxu3 %v2077_v61 }
  0x36   : > { %619 = vmatpush.msrb.mxu2 %v526_v36  ;;  %563 = vmatpush.msra.mxu1 %v2077_v61 }
  0x37   : > { %2275 = vmatpush.msra.mxu3 %v2076_v63 }
  0x38   : > { %620 = vmatpush.msrb.mxu2 %v525_v38  ;;  %564 = vmatpush.msra.mxu1 %v2076_v63  ;;  %v2093_v38 = vld [vmem:[%s3505_s3 + $0x108] sm:$0xff] }
  0x39   : > { %696 = vmatpush.msrb.mxu3 %v2107_v1 }
  0x3a   : > { %621 = vmatpush.msrb.mxu2 %v524_v40 }
  0x3b   : > { %409 = vmatmul.f32.gmra.mxu0 %v353_v20  ;;  %433 = vmatmul.f32.gmra.mxu2 %v361_v21 }
  0x3c   : > { %622 = vmatpush.msrb.mxu2 %v523_v44  ;;  %697 = vmatpush.msrb.mxu3 %v2106_v2 }
  0x3e   : > { %623 = vmatpush.msrb.mxu2 %v522_v45  ;;  %698 = vmatpush.msrb.mxu3 %v2105_v3 }
  0x40   : > { %624 = vmatpush.msrb.mxu2 %v521_v54  ;;  %699 = vmatpush.msrb.mxu3 %v2104_v4 }
  0x42   : > { %625 = vmatpush.msrb.mxu2 %v520_v56  ;;  %700 = vmatpush.msrb.mxu3 %v2103_v8 }
  0x43   : > { %412 = vmatmul.f32.gmra.mxu0 %v354_v22  ;;  %436 = vmatmul.f32.gmra.mxu2 %v362_v23  ;;  %v2099_v22 = vld [vmem:[%s3505_s3 + $0x138] sm:$0xff]  ;;  %v2098_v23 = vld [vmem:[%s3505_s3 + $0x130] sm:$0xff] }
  0x44   : > { %626 = vmatpush.msrb.mxu2 %v519_v58  ;;  %701 = vmatpush.msrb.mxu3 %v2102_v9 }
  0x46   : > { %627 = vmatpush.msrb.mxu2 %v518_v60  ;;  %702 = vmatpush.msrb.mxu3 %v2101_v15 }
  0x48   : > { %628 = vmatpush.msrb.mxu2 %v517_v62  ;;  %703 = vmatpush.msrb.mxu3 %v2100_v16  ;;  %v825_v16 = vld [vmem:[%s3507_s5 + $0x60] sm:$0xff] }
  0x4a   : > { %629 = vmatpush.msrb.mxu2 %v516_v0  ;;  %704 = vmatpush.msrb.mxu3 %v2099_v22  ;;  %v823_v22 = vld [vmem:[%s3507_s5 + $0x50] sm:$0xff] }
  0x4b   : > { %415 = vmatmul.f32.gmra.mxu0 %v355_v32  ;;  %439 = vmatmul.f32.gmra.mxu2 %v363_v33 }
  0x4c   : > { %705 = vmatpush.msrb.mxu3 %v2098_v23  ;;  %v822_v23 = vld [vmem:[%s3507_s5 + $0x48] sm:$0xff] }
  0x4e   : > { %706 = vmatpush.msrb.mxu3 %v2097_v29  ;;  %v820_v29 = vld [vmem:[%s3507_s5 + $0x38] sm:$0xff] }
  0x50   : > { %707 = vmatpush.msrb.mxu3 %v2096_v30 }
  0x52   : > { %708 = vmatpush.msrb.mxu3 %v2095_v35  ;;  %v818_v35 = vld [vmem:[%s3507_s5 + $0x28] sm:$0xff] }
  0x53   : > { %418 = vmatmul.f32.gmra.mxu0 %v356_v42  ;;  %442 = vmatmul.f32.gmra.mxu2 %v364_v43 }
  0x54   : > { %709 = vmatpush.msrb.mxu3 %v2094_v37 }
  0x56   : > { %710 = vmatpush.msrb.mxu3 %v2093_v38  ;;  %v817_v38 = vld [vmem:[%s3507_s5 + $0x20] sm:$0xff] }
  0x58   : > { %711 = vmatpush.msrb.mxu3 %v2092_v41 }
  0x5b   : > { %421 = vmatmul.f32.gmra.mxu0 %v357_v46  ;;  %445 = vmatmul.f32.gmra.mxu2 %v365_v47 }
  0x63   : > { %424 = vmatmul.f32.gmra.mxu0 %v358_v48  ;;  %448 = vmatmul.f32.gmra.mxu2 %v366_v49 }
  0xa8   : > { %v404_v6 = vpop.f32.mrf.mxu0 }
  0xa9   : > { %v2552_v7 = vadd.f32 %v2549_v5, %v404_v6  ;;  %v828_v6 = vld [vmem:[%s3507_s5 + $0x78] sm:$0xff] }
  0xaa   : > { %829 = vmatpush.msrb.mxu0 %v828_v6 }
  0xab   : > { %452 = vst [vmem:[#allocation2 + $0x8] sm:$0xff] %v2552_v7  ;;  %565 = vmatmul.f32.vlgmr.msra.gmra.mxu1 %v2552_v7 }
  0xae   : > { %v428_v10 = vpop.f32.mrf.mxu2 }
  0xaf   : > { %v2563_v11 = vadd.f32 %v2549_v5, %v428_v10  ;;  %v827_v10 = vld [vmem:[%s3507_s5 + $0x70] sm:$0xff] }
  0xb0   : > { %v407_v12 = vpop.f32.mrf.mxu0  ;;  %830 = vmatpush.msrb.mxu0 %v827_v10  ;;  %v2154_v10 = vld [vmem:[%s3505_s3 + $0x2f0] sm:$0xff] }
  0xb1   : > { %460 = vst [vmem:[#allocation2 + $0x48] sm:$0xff] %v2563_v11  ;;  %v2567_v13 = vadd.f32 %v2549_v5, %v407_v12  ;;  %589 = vmatmul.f32.vlgmr.msra.gmra.mxu3 %v2563_v11  ;;  %v826_v12 = vld [vmem:[%s3507_s5 + $0x68] sm:$0xff] }
  0xb2   : > { %v484_v14 = vld [vmem:[#allocation2 + $0x7] sm:$0xff]  ;;  %831 = vmatpush.msrb.mxu0 %v826_v12 }
  0xb3   : > { %453 = vst [vmem:[#allocation2 + $0x10] sm:$0xff] %v2567_v13  ;;  %630 = vmatmul.f32.vlgmr.msrb.gmra.mxu2 %v484_v14  ;;  %568 = vmatmul.f32.gmra.mxu1 %v2567_v13 }
  0xb4   : > { %832 = vmatpush.msrb.mxu0 %v825_v16 }
  0xb6   : > { %v431_v17 = vpop.f32.mrf.mxu2 }
  0xb7   : > { %v2579_v18 = vadd.f32 %v2549_v5, %v431_v17  ;;  %v824_v17 = vld [vmem:[%s3507_s5 + $0x58] sm:$0xff] }
  0xb8   : > { %v410_v19 = vpop.f32.mrf.mxu0  ;;  %833 = vmatpush.msrb.mxu0 %v824_v17 }
  0xb9   : > { %461 = vst [vmem:[#allocation2 + $0x50] sm:$0xff] %v2579_v18  ;;  %v2583_v20 = vadd.f32 %v2549_v5, %v410_v19  ;;  %592 = vmatmul.f32.gmra.mxu3 %v2579_v18 }
  0xba   : > { %v485_v21 = vld [vmem:[#allocation2 + $0xf] sm:$0xff]  ;;  %834 = vmatpush.msrb.mxu0 %v823_v22 }
  0xbb   : > { %454 = vst [vmem:[#allocation2 + $0x18] sm:$0xff] %v2583_v20  ;;  %633 = vmatmul.f32.gmra.mxu2 %v485_v21  ;;  %571 = vmatmul.f32.gmra.mxu1 %v2583_v20  ;;  %v500_v58 = vld [vmem:[#allocation2 + $0x9] sm:$0xff] }
  0xbc   : > { %835 = vmatpush.msrb.mxu0 %v822_v23  ;;  %v2121_v22 = vld [vmem:[%s3505_s3 + $0x1e8] sm:$0xff] }
  0xbd   : > { %v2153_v23 = vld [vmem:[%s3505_s3 + $0x2e8] sm:$0xff] }
  0xbe   : > { %v434_v24 = vpop.f32.mrf.mxu2 }
  0xbf   : > { %v2595_v25 = vadd.f32 %v2549_v5, %v434_v24 }
  0xc0   : > { %v413_v26 = vpop.f32.mrf.mxu0  ;;  %v493_v61 = vld [vmem:[#allocation2 + $0x4f] sm:$0xff] }
  0xc1   : > { %462 = vst [vmem:[#allocation2 + $0x58] sm:$0xff] %v2595_v25  ;;  %v2599_v27 = vadd.f32 %v2549_v5, %v413_v26  ;;  %595 = vmatmul.f32.gmra.mxu3 %v2595_v25  ;;  %v508_v19 = vld [vmem:[#allocation2 + $0x49] sm:$0xff] }
  0xc2   : > { %v486_v28 = vld [vmem:[#allocation2 + $0x17] sm:$0xff] }
  0xc3   : > { %455 = vst [vmem:[#allocation2 + $0x20] sm:$0xff] %v2599_v27  ;;  %636 = vmatmul.f32.gmra.mxu2 %v486_v28  ;;  %574 = vmatmul.f32.gmra.mxu1 %v2599_v27  ;;  %v501_v60 = vld [vmem:[#allocation2 + $0x11] sm:$0xff]  ;;  %v821_v28 = vld [vmem:[%s3507_s5 + $0x40] sm:$0xff] }
  0xc4   : > { %836 = vmatpush.msrb.mxu0 %v821_v28 }
  0xc6   : > { %v437_v31 = vpop.f32.mrf.mxu2  ;;  %837 = vmatpush.msrb.mxu0 %v820_v29 }
  0xc7   : > { %v2611_v32 = vadd.f32 %v2549_v5, %v437_v31 }
  0xc8   : > { %v416_v33 = vpop.f32.mrf.mxu0  ;;  %v494_v63 = vld [vmem:[#allocation2 + $0x57] sm:$0xff] }
  0xc9   : > { %463 = vst [vmem:[#allocation2 + $0x60] sm:$0xff] %v2611_v32  ;;  %v2615_v34 = vadd.f32 %v2549_v5, %v416_v33  ;;  %598 = vmatmul.f32.gmra.mxu3 %v2611_v32  ;;  %v509_v24 = vld [vmem:[#allocation2 + $0x51] sm:$0xff] }
  0xca   : > { %v487_v36 = vld [vmem:[#allocation2 + $0x1f] sm:$0xff]  ;;  %v819_v33 = vld [vmem:[%s3507_s5 + $0x30] sm:$0xff] }
  0xcb   : > { %456 = vst [vmem:[#allocation2 + $0x28] sm:$0xff] %v2615_v34  ;;  %639 = vmatmul.f32.gmra.mxu2 %v487_v36  ;;  %577 = vmatmul.f32.gmra.mxu1 %v2615_v34  ;;  %v502_v62 = vld [vmem:[#allocation2 + $0x19] sm:$0xff] }
  0xcc   : > { %838 = vmatpush.msrb.mxu0 %v819_v33 }
  0xce   : > { %v440_v39 = vpop.f32.mrf.mxu2  ;;  %839 = vmatpush.msrb.mxu0 %v818_v35 }
  0xcf   : > { %v2630_v40 = vadd.f32 %v2549_v5, %v440_v39  ;;  %v816_v39 = vld [vmem:[%s3507_s5 + $0x18] sm:$0xff] }
  0xd0   : > { %v419_v42 = vpop.f32.mrf.mxu0  ;;  %v495_v1 = vld [vmem:[#allocation2 + $0x5f] sm:$0xff]  ;;  %840 = vmatpush.msrb.mxu0 %v817_v38 }
  0xd1   : > { %464 = vst [vmem:[#allocation2 + $0x68] sm:$0xff] %v2630_v40  ;;  %v2637_v43 = vadd.f32 %v2549_v5, %v419_v42  ;;  %601 = vmatmul.f32.gmra.mxu3 %v2630_v40  ;;  %v510_v30 = vld [vmem:[#allocation2 + $0x59] sm:$0xff] }
  0xd2   : > { %v488_v44 = vld [vmem:[#allocation2 + $0x27] sm:$0xff]  ;;  %841 = vmatpush.msrb.mxu0 %v816_v39 }
  0xd3   : > { %457 = vst [vmem:[#allocation2 + $0x30] sm:$0xff] %v2637_v43  ;;  %642 = vmatmul.f32.gmra.mxu2 %v488_v44  ;;  %580 = vmatmul.f32.gmra.mxu1 %v2637_v43  ;;  %v503_v0 = vld [vmem:[#allocation2 + $0x21] sm:$0xff] }
  0xd4   : > { %v2120_v38 = vld [vmem:[%s3505_s3 + $0x1e0] sm:$0xff] }
  0xd5   : > { %v2152_v39 = vld [vmem:[%s3505_s3 + $0x2e0] sm:$0xff] }
  0xd6   : > { %v443_v45 = vpop.f32.mrf.mxu2 }
  0xd7   : > { %v2643_v46 = vadd.f32 %v2549_v5, %v443_v45  ;;  %v815_v45 = vld [vmem:[%s3507_s5 + $0x10] sm:$0xff] }
  0xd8   : > { %v422_v47 = vpop.f32.mrf.mxu0  ;;  %v496_v3 = vld [vmem:[#allocation2 + $0x67] sm:$0xff]  ;;  %842 = vmatpush.msrb.mxu0 %v815_v45 }
  0xd9   : > { %465 = vst [vmem:[#allocation2 + $0x70] sm:$0xff] %v2643_v46  ;;  %v2647_v48 = vadd.f32 %v2549_v5, %v422_v47  ;;  %604 = vmatmul.f32.gmra.mxu3 %v2643_v46  ;;  %v511_v36 = vld [vmem:[#allocation2 + $0x61] sm:$0xff] }
  0xda   : > { %v489_v49 = vld [vmem:[#allocation2 + $0x2f] sm:$0xff] }
  0xdb   : > { %458 = vst [vmem:[#allocation2 + $0x38] sm:$0xff] %v2647_v48  ;;  %645 = vmatmul.f32.gmra.mxu2 %v489_v49  ;;  %583 = vmatmul.f32.gmra.mxu1 %v2647_v48  ;;  %v504_v2 = vld [vmem:[#allocation2 + $0x29] sm:$0xff] }
  0xdc   : > { %v814_v47 = vld [vmem:[%s3507_s5 + $0x8] sm:$0xff] }
  0xdd   : > { %843 = vmatpush.msrb.mxu0 %v814_v47 }
  0xde   : > { %v446_v50 = vpop.f32.mrf.mxu2 }
  0xdf   : > { %v2653_v51 = vadd.f32 %v2549_v5, %v446_v50  ;;  %v813_v50 = vld [vmem:[%s3507_s5] sm:$0xff] }
  0xe0   : > { %v425_v52 = vpop.f32.mrf.mxu0  ;;  %v512_v41 = vld [vmem:[#allocation2 + $0x69] sm:$0xff]  ;;  %844 = vmatpush.msrb.mxu0 %v813_v50 }
  0xe1   : > { %466 = vst [vmem:[#allocation2 + $0x78] sm:$0xff] %v2653_v51  ;;  %v2657_v53 = vadd.f32 %v2549_v5, %v425_v52  ;;  %607 = vmatmul.f32.gmra.mxu3 %v2653_v51 }
  0xe2   : > { %v490_v54 = vld [vmem:[#allocation2 + $0x37] sm:$0xff] }
  0xe3   : > { %459 = vst [vmem:[#allocation2 + $0x40] sm:$0xff] %v2657_v53  ;;  %648 = vmatmul.f32.gmra.mxu2 %v490_v54  ;;  %586 = vmatmul.f32.gmra.mxu1 %v2657_v53  ;;  %v505_v4 = vld [vmem:[#allocation2 + $0x31] sm:$0xff] }
  0xe6   : > { %v449_v55 = vpop.f32.mrf.mxu2 }
  0xe7   : > { %v2663_v56 = vadd.f32 %v2549_v5, %v449_v55  ;;  %v497_v5 = vld [vmem:[#allocation2 + $0x6f] sm:$0xff] }
  0xe8   : > { %v498_v9 = vld [vmem:[#allocation2 + $0x77] sm:$0xff] }
  0xe9   : > { %467 = vst [vmem:[#allocation2 + $0x80] sm:$0xff] %v2663_v56  ;;  %610 = vmatmul.f32.gmra.mxu3 %v2663_v56  ;;  %v513_v49 = vld [vmem:[#allocation2 + $0x71] sm:$0xff] }
  0xea   : > { %v491_v57 = vld [vmem:[#allocation2 + $0x3f] sm:$0xff]  ;;  %v492_v59 = vld [vmem:[#allocation2 + $0x47] sm:$0xff] }
  0xeb   : > { %651 = vmatmul.f32.gmra.mxu2 %v491_v57  ;;  %v506_v8 = vld [vmem:[#allocation2 + $0x39] sm:$0xff]  ;;  %v507_v14 = vld [vmem:[#allocation2 + $0x41] sm:$0xff] }
  0xf0   : > { %v499_v15 = vld [vmem:[#allocation2 + $0x7f] sm:$0xff] }
  0xf1   : > { %712 = vmatmul.f32.vlgmr.msrb.gmra.mxu3 %v500_v58  ;;  %v514_v55 = vld [vmem:[#allocation2 + $0x79] sm:$0xff] }
  0xf3   : > { %654 = vmatmul.f32.gmra.mxu2 %v492_v59 }
  0xf9   : > { %715 = vmatmul.f32.gmra.mxu3 %v501_v60  ;;  %v515_v60 = vld [vmem:[#allocation2 + $0x81] sm:$0xff] }
  0xfb   : > { %657 = vmatmul.f32.gmra.mxu2 %v493_v61 }
 0x101   : > { %718 = vmatmul.f32.gmra.mxu3 %v502_v62 }
 0x103   : > { %660 = vmatmul.f32.gmra.mxu2 %v494_v63  ;;  %v2123_v63 = vld [vmem:[%s3505_s3 + $0x1f8] sm:$0xff] }
 0x104   : > { %1093 = vmatpush.msra.mxu2 %v2123_v63 }
 0x109   : > { %721 = vmatmul.f32.gmra.mxu3 %v503_v0  ;;  %v2155_v0 = vld [vmem:[%s3505_s3 + $0x2f8] sm:$0xff] }
 0x10a   : > { %1175 = vmatpush.msra.mxu3 %v2155_v0 }
 0x10b   : > { %663 = vmatmul.f32.gmra.mxu2 %v495_v1 }
 0x10c   : > { %1176 = vmatpush.msra.mxu3 %v2154_v10 }
 0x10e   : > { %1177 = vmatpush.msra.mxu3 %v2153_v23  ;;  %v2116_v23 = vld [vmem:[%s3505_s3 + $0x1c0] sm:$0xff] }
 0x110   : > { %1178 = vmatpush.msra.mxu3 %v2152_v39 }
 0x111   : > { %724 = vmatmul.f32.gmra.mxu3 %v504_v2 }
 0x113   : > { %666 = vmatmul.f32.gmra.mxu2 %v496_v3  ;;  %v2740_v3 = vld [vmem:[%s3506_s4] ss:$0 sm:$0xff] }
 0x119   : > { %727 = vmatmul.f32.gmra.mxu3 %v505_v4 }
 0x11b   : > { %669 = vmatmul.f32.gmra.mxu2 %v497_v5 }
 0x121   : > { %730 = vmatmul.f32.gmra.mxu3 %v506_v8 }
 0x123   : > { %672 = vmatmul.f32.gmra.mxu2 %v498_v9  ;;  %v2122_v9 = vld [vmem:[%s3505_s3 + $0x1f0] sm:$0xff] }
 0x124   : > { %1094 = vmatpush.msra.mxu2 %v2122_v9  ;;  %v2117_v9 = vld [vmem:[%s3505_s3 + $0x1c8] sm:$0xff] }
 0x126   : > { %1095 = vmatpush.msra.mxu2 %v2121_v22 }
 0x128   : > { %v566_v57 = vpop.f32.mrf.mxu1  ;;  %1096 = vmatpush.msra.mxu2 %v2120_v38  ;;  %v2115_v38 = vld [vmem:[%s3505_s3 + $0x1b8] sm:$0xff] }
 0x129   : > { %733 = vmatmul.f32.gmra.mxu3 %v507_v14 }
 0x12b   : > { %675 = vmatmul.f32.gmra.mxu2 %v499_v15 }
 0x130   : > { %v569_v61 = vpop.f32.mrf.mxu1 }
 0x131   : > { %736 = vmatmul.f32.gmra.mxu3 %v508_v19 }
 0x134   : > { %v2682_v21 = vpop.f32.mrf.mxu3 }
 0x136   : > { %v631_v42 = vpop.f32.mrf.mxu2 }
 0x137   : > { %v632_v2 = vadd.f32 %v631_v42, %v566_v57  ;;  %v2151_v57 = vld [vmem:[%s3505_s3 + $0x2d8] sm:$0xff] }
 0x138   : > { %v572_v6 = vpop.f32.mrf.mxu1  ;;  %1179 = vmatpush.msra.mxu3 %v2151_v57 }
 0x139   : > { %739 = vmatmul.f32.gmra.mxu3 %v509_v24 }
 0x13c   : > { %v2690_v26 = vpop.f32.mrf.mxu3 }
 0x13e   : > { %v634_v52 = vpop.f32.mrf.mxu2 }
 0x13f   : > { %v635_v15 = vadd.f32 %v634_v52, %v569_v61  ;;  %v2118_v61 = vld [vmem:[%s3505_s3 + $0x1d0] sm:$0xff] }
 0x140   : > { %v575_v24 = vpop.f32.mrf.mxu1 }
 0x141   : > { %742 = vmatmul.f32.gmra.mxu3 %v510_v30 }
 0x144   : > { %v2698_v31 = vpop.f32.mrf.mxu3 }
 0x146   : > { %v637_v59 = vpop.f32.mrf.mxu2 }
 0x147   : > { %v638_v29 = vadd.f32 %v637_v59, %v572_v6 }
 0x148   : > { %v578_v42 = vpop.f32.mrf.mxu1 }
 0x149   : > { %745 = vmatmul.f32.gmra.mxu3 %v511_v36 }
 0x14c   : > { %v2706_v37 = vpop.f32.mrf.mxu3 }
 0x14e   : > { %v640_v1 = vpop.f32.mrf.mxu2 }
 0x14f   : > { %v641_v45 = vadd.f32 %v640_v1, %v575_v24 }
 0x150   : > { %v581_v63 = vpop.f32.mrf.mxu1 }
 0x151   : > { %748 = vmatmul.f32.gmra.mxu3 %v512_v41 }
 0x154   : > { %v2714_v44 = vpop.f32.mrf.mxu3 }
 0x156   : > { %v643_v14 = vpop.f32.mrf.mxu2 }
 0x159   : > { %751 = vmatmul.f32.gmra.mxu3 %v513_v49 }
 0x15c   : > { %v2725_v54 = vpop.f32.mrf.mxu3 }
 0x15e   : > { %v646_v30 = vpop.f32.mrf.mxu2 }
 0x161   : > { %754 = vmatmul.f32.gmra.mxu3 %v514_v55  ;;  %v2119_v55 = vld [vmem:[%s3505_s3 + $0x1d8] sm:$0xff] }
 0x162   : > { %1097 = vmatpush.msra.mxu2 %v2119_v55  ;;  %v2114_v55 = vld [vmem:[%s3505_s3 + $0x1b0] sm:$0xff] }
 0x164   : > { %v2727_v58 = vpop.f32.mrf.mxu3  ;;  %1098 = vmatpush.msra.mxu2 %v2118_v61  ;;  %v2146_v61 = vld [vmem:[%s3505_s3 + $0x2b0] sm:$0xff] }
 0x166   : > { %v649_v50 = vpop.f32.mrf.mxu2  ;;  %1099 = vmatpush.msra.mxu2 %v2117_v9  ;;  %v2145_v9 = vld [vmem:[%s3505_s3 + $0x2a8] sm:$0xff] }
 0x168   : > { %1100 = vmatpush.msra.mxu2 %v2116_v23  ;;  %v2144_v23 = vld [vmem:[%s3505_s3 + $0x2a0] sm:$0xff] }
 0x169   : > { %757 = vmatmul.f32.gmra.mxu3 %v515_v60  ;;  %v644_v60 = vadd.f32 %v643_v14, %v578_v42  ;;  %v2149_v14 = vld [vmem:[%s3505_s3 + $0x2c8] sm:$0xff] }
 0x16a   : > { %1101 = vmatpush.msra.mxu2 %v2115_v38 }
 0x16c   : > { %v2729_v62 = vpop.f32.mrf.mxu3  ;;  %1102 = vmatpush.msra.mxu2 %v2114_v55 }
 0x174   : > { %v713_v4 = vpop.f32.mrf.mxu3 }
 0x175   : > { %v761_v5 = vadd.f32 %v713_v4, %v632_v2  ;;  %v2150_v2 = vld [vmem:[%s3505_s3 + $0x2d0] sm:$0xff] }
 0x176   : > { %1180 = vmatpush.msra.mxu3 %v2150_v2 }
 0x177   : > { %v781_v8 = vadd.f32 %v2740_v3, %v761_v5  ;;  %v652_v5 = vpop.f32.mrf.mxu2 }
 0x178   : > { %1181 = vmatpush.msra.mxu3 %v2149_v14 }
 0x179   : > { %v797_v12 = vmax.f32 %v781_v8, 0.0  ;;  %v647_v8 = vadd.f32 %v646_v30, %v581_v63 }
 0x17b   : > { %845 = vmatmul.f32.vlgmr.msrb.gmra.mxu0 %v797_v12 }
 0x17c   : > { %v716_v16 = vpop.f32.mrf.mxu3 }
 0x17d   : > { %v762_v17 = vadd.f32 %v716_v16, %v635_v15  ;;  %v584_v15 = vpop.f32.mrf.mxu1 }
 0x17e   : > { %v650_v22 = vadd.f32 %v649_v50, %v584_v15 }
 0x17f   : > { %v782_v19 = vadd.f32 %v2740_v3, %v762_v17 }
 0x181   : > { %v798_v28 = vmax.f32 %v782_v19, 0.0  ;;  %v655_v19 = vpop.f32.mrf.mxu2 }
 0x183   : > { %848 = vmatmul.f32.gmra.mxu0 %v798_v28 }
 0x184   : > { %v719_v33 = vpop.f32.mrf.mxu3 }
 0x185   : > { %v763_v35 = vadd.f32 %v719_v33, %v638_v29  ;;  %v2148_v29 = vld [vmem:[%s3505_s3 + $0x2c0] sm:$0xff]  ;;  %v587_v33 = vpop.f32.mrf.mxu1 }
 0x186   : > { %1182 = vmatpush.msra.mxu3 %v2148_v29 }
 0x187   : > { %v783_v36 = vadd.f32 %v2740_v3, %v763_v35 }
 0x189   : > { %v799_v41 = vmax.f32 %v783_v36, 0.0  ;;  %v653_v36 = vadd.f32 %v652_v5, %v587_v33  ;;  %v658_v39 = vpop.f32.mrf.mxu2  ;;  %v2111_v33 = vld [vmem:[%s3505_s3 + $0x198] sm:$0xff] }
 0x18a   : > { %v659_v2 = vadd.f32 %v658_v39, %v2690_v26  ;;  %v2135_v26 = vld [vmem:[%s3505_s3 + $0x258] sm:$0xff] }
 0x18b   : > { %851 = vmatmul.f32.gmra.mxu0 %v799_v41  ;;  %v2143_v39 = vld [vmem:[%s3505_s3 + $0x298] sm:$0xff] }
 0x18c   : > { %v722_v47 = vpop.f32.mrf.mxu3 }
 0x18d   : > { %v764_v49 = vadd.f32 %v722_v47, %v641_v45  ;;  %v2147_v45 = vld [vmem:[%s3505_s3 + $0x2b8] sm:$0xff] }
 0x18e   : > { %v2139_v47 = vld [vmem:[%s3505_s3 + $0x278] sm:$0xff]  ;;  %1183 = vmatpush.msra.mxu3 %v2147_v45 }
 0x18f   : > { %v784_v52 = vadd.f32 %v2740_v3, %v764_v49  ;;  %1028 = vmatpush.msrb.mxu1 %v2139_v47  ;;  %v2129_v47 = vld [vmem:[%s3505_s3 + $0x228] sm:$0xff] }
 0x190   : > { %1184 = vmatpush.msra.mxu3 %v2146_v61 }
 0x191   : > { %v800_v59 = vmax.f32 %v784_v52, 0.0  ;;  %v656_v52 = vadd.f32 %v655_v19, %v2682_v21  ;;  %v2137_v21 = vld [vmem:[%s3505_s3 + $0x268] sm:$0xff]  ;;  %v661_v63 = vpop.f32.mrf.mxu2 }
 0x192   : > { %1185 = vmatpush.msra.mxu3 %v2145_v9  ;;  %v662_v15 = vadd.f32 %v661_v63, %v2698_v31  ;;  %v2133_v31 = vld [vmem:[%s3505_s3 + $0x248] sm:$0xff] }
 0x193   : > { %854 = vmatmul.f32.gmra.mxu0 %v800_v59 }
 0x194   : > { %v725_v0 = vpop.f32.mrf.mxu3  ;;  %1186 = vmatpush.msra.mxu3 %v2144_v23 }
 0x195   : > { %v765_v1 = vadd.f32 %v725_v0, %v644_v60  ;;  %v2138_v60 = vld [vmem:[%s3505_s3 + $0x270] sm:$0xff] }
 0x196   : > { %1029 = vmatpush.msrb.mxu1 %v2138_v60  ;;  %1187 = vmatpush.msra.mxu3 %v2143_v39 }
 0x197   : > { %v785_v4 = vadd.f32 %v2740_v3, %v765_v1 }
 0x198   : > { %1030 = vmatpush.msrb.mxu1 %v2137_v21  ;;  %v2126_v21 = vld [vmem:[%s3505_s3 + $0x210] sm:$0xff] }
 0x199   : > { %v801_v6 = vmax.f32 %v785_v4, 0.0  ;;  %v2113_v4 = vld [vmem:[%s3505_s3 + $0x1a8] sm:$0xff] }
 0x19a   : > { %1103 = vmatpush.msra.mxu2 %v2113_v4  ;;  %v2124_v4 = vld [vmem:[%s3505_s3 + $0x200] sm:$0xff] }
 0x19b   : > { %857 = vmatmul.f32.gmra.mxu0 %v801_v6 }
 0x19c   : > { %v728_v10 = vpop.f32.mrf.mxu3 }
 0x19d   : > { %v766_v12 = vadd.f32 %v728_v10, %v647_v8  ;;  %v2136_v8 = vld [vmem:[%s3505_s3 + $0x260] sm:$0xff] }
 0x19e   : > { %1031 = vmatpush.msrb.mxu1 %v2136_v8  ;;  %v2141_v8 = vld [vmem:[%s3505_s3 + $0x288] sm:$0xff] }
 0x19f   : > { %v786_v16 = vadd.f32 %v2740_v3, %v766_v12  ;;  %v664_v12 = vpop.f32.mrf.mxu2 }
 0x1a0   : > { %1032 = vmatpush.msrb.mxu1 %v2135_v26 }
 0x1a1   : > { %v802_v17 = vmax.f32 %v786_v16, 0.0  ;;  %v2112_v16 = vld [vmem:[%s3505_s3 + $0x1a0] sm:$0xff] }
 0x1a2   : > { %1104 = vmatpush.msra.mxu2 %v2112_v16  ;;  %v2140_v16 = vld [vmem:[%s3505_s3 + $0x280] sm:$0xff] }
 0x1a3   : > { %860 = vmatmul.f32.gmra.mxu0 %v802_v17 }
 0x1a4   : > { %v731_v24 = vpop.f32.mrf.mxu3  ;;  %1105 = vmatpush.msra.mxu2 %v2111_v33 }
 0x1a5   : > { %v767_v28 = vadd.f32 %v731_v24, %v650_v22  ;;  %v2134_v22 = vld [vmem:[%s3505_s3 + $0x250] sm:$0xff] }
 0x1a6   : > { %1033 = vmatpush.msrb.mxu1 %v2134_v22 }
 0x1a7   : > { %v787_v30 = vadd.f32 %v2740_v3, %v767_v28  ;;  %v667_v29 = vpop.f32.mrf.mxu2 }
 0x1a8   : > { %1034 = vmatpush.msrb.mxu1 %v2133_v31 }
 0x1a9   : > { %v803_v35 = vmax.f32 %v787_v30, 0.0  ;;  %v665_v30 = vadd.f32 %v664_v12, %v2706_v37  ;;  %v2131_v37 = vld [vmem:[%s3505_s3 + $0x238] sm:$0xff] }
 0x1ab   : > { %863 = vmatmul.f32.gmra.mxu0 %v803_v35 }
 0x1ac   : > { %v734_v41 = vpop.f32.mrf.mxu3 }
 0x1ad   : > { %v768_v42 = vadd.f32 %v734_v41, %v653_v36  ;;  %v2132_v36 = vld [vmem:[%s3505_s3 + $0x240] sm:$0xff] }
 0x1ae   : > { %1035 = vmatpush.msrb.mxu1 %v2132_v36 }
 0x1af   : > { %v788_v49 = vadd.f32 %v2740_v3, %v768_v42  ;;  %v2130_v42 = vld [vmem:[%s3505_s3 + $0x230] sm:$0xff]  ;;  %v670_v55 = vpop.f32.mrf.mxu2 }
 0x1b0   : > { %1036 = vmatpush.msrb.mxu1 %v2131_v37 }
 0x1b1   : > { %v804_v50 = vmax.f32 %v788_v49, 0.0  ;;  %v668_v49 = vadd.f32 %v667_v29, %v2714_v44  ;;  %v2127_v44 = vld [vmem:[%s3505_s3 + $0x218] sm:$0xff] }
 0x1b2   : > { %1037 = vmatpush.msrb.mxu1 %v2130_v42  ;;  %v2172_v29 = vld [vmem:[%s3507_s5 + $0xf8] sm:$0xff] }
 0x1b3   : > { %866 = vmatmul.f32.gmra.mxu0 %v804_v50  ;;  %v2110_v50 = vld [vmem:[%s3505_s3 + $0x190] sm:$0xff] }
 0x1b4   : > { %v737_v57 = vpop.f32.mrf.mxu3  ;;  %1038 = vmatpush.msrb.mxu1 %v2129_v47  ;;  %1106 = vmatpush.msra.mxu2 %v2110_v50 }
 0x1b5   : > { %v769_v59 = vadd.f32 %v737_v57, %v656_v52  ;;  %v2142_v52 = vld [vmem:[%s3505_s3 + $0x290] sm:$0xff]  ;;  %1310 = vmatpush.msra.mxu0 %v2172_v29 }
 0x1b6   : > { %1188 = vmatpush.msra.mxu3 %v2142_v52 }
 0x1b7   : > { %v789_v0 = vadd.f32 %v2740_v3, %v769_v59  ;;  %v2128_v59 = vld [vmem:[%s3505_s3 + $0x220] sm:$0xff]  ;;  %v673_v9 = vpop.f32.mrf.mxu2 }
 0x1b8   : > { %1039 = vmatpush.msrb.mxu1 %v2128_v59  ;;  %1189 = vmatpush.msra.mxu3 %v2141_v8  ;;  %v2168_v59 = vld [vmem:[%s3507_s5 + $0xd8] sm:$0xff] }
 0x1b9   : > { %v805_v1 = vmax.f32 %v789_v0, 0.0  ;;  %v2125_v0 = vld [vmem:[%s3505_s3 + $0x208] sm:$0xff] }
 0x1ba   : > { %1040 = vmatpush.msrb.mxu1 %v2127_v44  ;;  %1190 = vmatpush.msra.mxu3 %v2140_v16  ;;  %v2164_v16 = vld [vmem:[%s3507_s5 + $0xb8] sm:$0xff] }
 0x1bb   : > { %869 = vmatmul.f32.gmra.mxu0 %v805_v1  ;;  %v671_v1 = vadd.f32 %v670_v55, %v2725_v54 }
 0x1bc   : > { %v740_v5 = vpop.f32.mrf.mxu3  ;;  %1041 = vmatpush.msrb.mxu1 %v2126_v21 }
 0x1bd   : > { %v770_v6 = vadd.f32 %v740_v5, %v659_v2 }
 0x1be   : > { %1042 = vmatpush.msrb.mxu1 %v2125_v0 }
 0x1bf   : > { %v790_v10 = vadd.f32 %v2740_v3, %v770_v6  ;;  %v2109_v6 = vld [vmem:[%s3505_s3 + $0x188] sm:$0xff] }
 0x1c0   : > { %1043 = vmatpush.msrb.mxu1 %v2124_v4  ;;  %1107 = vmatpush.msra.mxu2 %v2109_v6 }
 0x1c1   : > { %v806_v14 = vmax.f32 %v790_v10, 0.0  ;;  %v674_v10 = vadd.f32 %v673_v9, %v2727_v58 }
 0x1c3   : > { %872 = vmatmul.f32.gmra.mxu0 %v806_v14  ;;  %v2108_v14 = vld [vmem:[%s3505_s3 + $0x180] sm:$0xff] }
 0x1c4   : > { %v743_v17 = vpop.f32.mrf.mxu3  ;;  %1108 = vmatpush.msra.mxu2 %v2108_v14 }
 0x1c5   : > { %v771_v19 = vadd.f32 %v743_v17, %v662_v15 }
 0x1c7   : > { %v791_v24 = vadd.f32 %v2740_v3, %v771_v19  ;;  %v676_v19 = vpop.f32.mrf.mxu2 }
 0x1c8   : > { %v677_v23 = vadd.f32 %v676_v19, %v2729_v62 }
 0x1c9   : > { %v807_v28 = vmax.f32 %v791_v24, 0.0 }
 0x1cb   : > { %875 = vmatmul.f32.gmra.mxu0 %v807_v28 }
 0x1cc   : > { %v746_v35 = vpop.f32.mrf.mxu3 }
 0x1cd   : > { %v772_v38 = vadd.f32 %v746_v35, %v665_v30  ;;  %v2910_v30 = vld [vmem:[%s3508_s6] ss:$0 sm:$0xff] }
 0x1cf   : > { %v792_v41 = vadd.f32 %v2740_v3, %v772_v38 }
 0x1d1   : > { %v808_v45 = vmax.f32 %v792_v41, 0.0 }
 0x1d3   : > { %878 = vmatmul.f32.gmra.mxu0 %v808_v45 }
 0x1d4   : > { %v749_v57 = vpop.f32.mrf.mxu3 }
 0x1d5   : > { %v773_v60 = vadd.f32 %v749_v57, %v668_v49  ;;  %v2169_v49 = vld [vmem:[%s3507_s5 + $0xe0] sm:$0xff] }
 0x1d7   : > { %v793_v61 = vadd.f32 %v2740_v3, %v773_v60 }
 0x1d9   : > { %v809_v63 = vmax.f32 %v793_v61, 0.0 }
 0x1db   : > { %881 = vmatmul.f32.gmra.mxu0 %v809_v63  ;;  %v2167_v63 = vld [vmem:[%s3507_s5 + $0xd0] sm:$0xff] }
 0x1dc   : > { %v752_v2 = vpop.f32.mrf.mxu3 }
 0x1dd   : > { %v774_v5 = vadd.f32 %v752_v2, %v671_v1 }
 0x1df   : > { %v794_v54 = vadd.f32 %v2740_v3, %v774_v5  ;;  %v2166_v5 = vld [vmem:[%s3507_s5 + $0xc8] sm:$0xff] }
 0x1e1   : > { %v810_v26 = vmax.f32 %v794_v54, 0.0 }
 0x1e3   : > { %884 = vmatmul.f32.gmra.mxu0 %v810_v26  ;;  %v2165_v26 = vld [vmem:[%s3507_s5 + $0xc0] sm:$0xff] }
 0x1e4   : > { %v755_v12 = vpop.f32.mrf.mxu3 }
 0x1e5   : > { %v775_v15 = vadd.f32 %v755_v12, %v674_v10 }
 0x1e7   : > { %v795_v17 = vadd.f32 %v2740_v3, %v775_v15 }
 0x1e9   : > { %v811_v22 = vmax.f32 %v795_v17, 0.0 }
 0x1eb   : > { %887 = vmatmul.f32.gmra.mxu0 %v811_v22 }
 0x1ec   : > { %v758_v58 = vpop.f32.mrf.mxu3 }
 0x1ed   : > { %v776_v31 = vadd.f32 %v758_v58, %v677_v23  ;;  %v2163_v58 = vld [vmem:[%s3507_s5 + $0xb0] sm:$0xff] }
 0x1ef   : > { %v796_v24 = vadd.f32 %v2740_v3, %v776_v31  ;;  %v2171_v3 = vld [vmem:[%s3507_s5 + $0xf0] sm:$0xff] }
 0x1f0   : > { %1311 = vmatpush.msra.mxu0 %v2171_v3 }
 0x1f1   : > { %v812_v28 = vmax.f32 %v796_v24, 0.0 }
 0x1f3   : > { %890 = vmatmul.f32.gmra.mxu0 %v812_v28 }
 0x1f8   : > { %v846_v33 = vpop.f32.mrf.mxu0 }
 0x1f9   : > { %v894_v62 = vadd.f32 %v846_v33, %v2552_v7  ;;  %v2170_v7 = vld [vmem:[%s3507_s5 + $0xe8] sm:$0xff] }
 0x1fa   : > { %1312 = vmatpush.msra.mxu0 %v2170_v7  ;;  %v2162_v33 = vld [vmem:[%s3507_s5 + $0xa8] sm:$0xff] }
 0x1fb   : > { %v2914_v35 = vadd.f32 %v2910_v30, %v894_v62 }
 0x1fc   : > { %1313 = vmatpush.msra.mxu0 %v2169_v49 }
 0x1fd   : > { %930 = vst [vmem:[#allocation2 + $0x8] sm:$0xff] %v2914_v35  ;;  %1044 = vmatmul.f32.vlgmr.msrb.gmra.mxu1 %v2914_v35 }
 0x1fe   : > { %1314 = vmatpush.msra.mxu0 %v2168_v59 }
 0x200   : > { %v849_v36 = vpop.f32.mrf.mxu0  ;;  %1315 = vmatpush.msra.mxu0 %v2167_v63 }
 0x201   : > { %v895_v38 = vadd.f32 %v849_v36, %v2567_v13 }
 0x202   : > { %1316 = vmatpush.msra.mxu0 %v2166_v5 }
 0x203   : > { %v2923_v39 = vadd.f32 %v2910_v30, %v895_v38 }
 0x204   : > { %v962_v37 = vld [vmem:[#allocation2 + $0x6] sm:$0xff]  ;;  %1317 = vmatpush.msra.mxu0 %v2165_v26 }
 0x205   : > { %931 = vst [vmem:[#allocation2 + $0x10] sm:$0xff] %v2923_v39  ;;  %1109 = vmatmul.f32.vlgmr.msra.gmra.mxu2 %v962_v37  ;;  %1047 = vmatmul.f32.gmra.mxu1 %v2923_v39  ;;  %v2161_v37 = vld [vmem:[%s3507_s5 + $0xa0] sm:$0xff] }
 0x206   : > { %1318 = vmatpush.msra.mxu0 %v2164_v16  ;;  %v2221_v16 = vld [vmem:[%s3505_s3 + $0x478] sm:$0xff] }
 0x207   : > { %1642 = vmatpush.msrb.mxu3 %v2221_v16 }
 0x208   : > { %v852_v41 = vpop.f32.mrf.mxu0  ;;  %1319 = vmatpush.msra.mxu0 %v2163_v58 }
 0x209   : > { %v896_v42 = vadd.f32 %v852_v41, %v2583_v20 }
 0x20a   : > { %1320 = vmatpush.msra.mxu0 %v2162_v33  ;;  %v2220_v33 = vld [vmem:[%s3505_s3 + $0x470] sm:$0xff] }
 0x20b   : > { %v2932_v45 = vadd.f32 %v2910_v30, %v896_v42  ;;  %1643 = vmatpush.msrb.mxu3 %v2220_v33 }
 0x20c   : > { %v963_v13 = vld [vmem:[#allocation2 + $0xe] sm:$0xff]  ;;  %1321 = vmatpush.msra.mxu0 %v2161_v37 }
 0x20d   : > { %v978_v47 = vld [vmem:[#allocation2 + $0xa] sm:$0xff]  ;;  %932 = vst [vmem:[#allocation2 + $0x18] sm:$0xff] %v2932_v45  ;;  %1112 = vmatmul.f32.gmra.mxu2 %v963_v13  ;;  %1050 = vmatmul.f32.gmra.mxu1 %v2932_v45 }
 0x20e   : > { %1191 = vmatmul.f32.vlgmr.msra.gmra.mxu3 %v978_v47  ;;  %v2160_v47 = vld [vmem:[%s3507_s5 + $0x98] sm:$0xff] }
 0x20f   : > { %1322 = vmatpush.msra.mxu0 %v2160_v47  ;;  %v2219_v47 = vld [vmem:[%s3505_s3 + $0x468] sm:$0xff] }
 0x210   : > { %v855_v50 = vpop.f32.mrf.mxu0  ;;  %1644 = vmatpush.msrb.mxu3 %v2219_v47 }
 0x211   : > { %v897_v52 = vadd.f32 %v855_v50, %v2599_v27 }
 0x213   : > { %v2941_v20 = vadd.f32 %v2910_v30, %v897_v52 }
 0x214   : > { %v964_v55 = vld [vmem:[#allocation2 + $0x16] sm:$0xff] }
 0x215   : > { %v979_v57 = vld [vmem:[#allocation2 + $0x12] sm:$0xff]  ;;  %933 = vst [vmem:[#allocation2 + $0x20] sm:$0xff] %v2941_v20  ;;  %1115 = vmatmul.f32.gmra.mxu2 %v964_v55  ;;  %1053 = vmatmul.f32.gmra.mxu1 %v2941_v20 }
 0x216   : > { %1194 = vmatmul.f32.gmra.mxu3 %v979_v57  ;;  %v2159_v57 = vld [vmem:[%s3507_s5 + $0x90] sm:$0xff] }
 0x217   : > { %1323 = vmatpush.msra.mxu0 %v2159_v57 }
 0x218   : > { %v858_v60 = vpop.f32.mrf.mxu0 }
 0x219   : > { %v898_v44 = vadd.f32 %v858_v60, %v2615_v34 }
 0x21b   : > { %v2950_v27 = vadd.f32 %v2910_v30, %v898_v44 }
 0x21c   : > { %v965_v61 = vld [vmem:[#allocation2 + $0x1e] sm:$0xff] }
 0x21d   : > { %v980_v21 = vld [vmem:[#allocation2 + $0x1a] sm:$0xff]  ;;  %934 = vst [vmem:[#allocation2 + $0x28] sm:$0xff] %v2950_v27  ;;  %1118 = vmatmul.f32.gmra.mxu2 %v965_v61  ;;  %1056 = vmatmul.f32.gmra.mxu1 %v2950_v27 }
 0x21e   : > { %1197 = vmatmul.f32.gmra.mxu3 %v980_v21  ;;  %v2158_v21 = vld [vmem:[%s3507_s5 + $0x88] sm:$0xff] }
 0x21f   : > { %1324 = vmatpush.msra.mxu0 %v2158_v21  ;;  %v2218_v21 = vld [vmem:[%s3505_s3 + $0x460] sm:$0xff] }
 0x220   : > { %v861_v0 = vpop.f32.mrf.mxu0  ;;  %1645 = vmatpush.msrb.mxu3 %v2218_v21 }
 0x221   : > { %v899_v1 = vadd.f32 %v861_v0, %v2637_v43 }
 0x223   : > { %v2959_v34 = vadd.f32 %v2910_v30, %v899_v1 }
 0x224   : > { %v966_v2 = vld [vmem:[#allocation2 + $0x26] sm:$0xff] }
 0x225   : > { %v981_v4 = vld [vmem:[#allocation2 + $0x22] sm:$0xff]  ;;  %935 = vst [vmem:[#allocation2 + $0x30] sm:$0xff] %v2959_v34  ;;  %1121 = vmatmul.f32.gmra.mxu2 %v966_v2  ;;  %1059 = vmatmul.f32.gmra.mxu1 %v2959_v34 }
 0x226   : > { %1200 = vmatmul.f32.gmra.mxu3 %v981_v4 }
 0x228   : > { %v864_v6 = vpop.f32.mrf.mxu0 }
 0x229   : > { %v900_v8 = vadd.f32 %v864_v6, %v2647_v48 }
 0x22b   : > { %v2968_v43 = vadd.f32 %v2910_v30, %v900_v8 }
 0x22c   : > { %v967_v9 = vld [vmem:[#allocation2 + $0x2e] sm:$0xff] }
 0x22d   : > { %v982_v54 = vld [vmem:[#allocation2 + $0x2a] sm:$0xff]  ;;  %936 = vst [vmem:[#allocation2 + $0x38] sm:$0xff] %v2968_v43  ;;  %1124 = vmatmul.f32.gmra.mxu2 %v967_v9  ;;  %1062 = vmatmul.f32.gmra.mxu1 %v2968_v43 }
 0x22e   : > { %1203 = vmatmul.f32.gmra.mxu3 %v982_v54 }
 0x230   : > { %v867_v10 = vpop.f32.mrf.mxu0 }
 0x231   : > { %v901_v12 = vadd.f32 %v867_v10, %v2657_v53 }
 0x233   : > { %v2977_v48 = vadd.f32 %v2910_v30, %v901_v12 }
 0x234   : > { %v968_v14 = vld [vmem:[#allocation2 + $0x36] sm:$0xff] }
 0x235   : > { %v983_v15 = vld [vmem:[#allocation2 + $0x32] sm:$0xff]  ;;  %937 = vst [vmem:[#allocation2 + $0x40] sm:$0xff] %v2977_v48  ;;  %1127 = vmatmul.f32.gmra.mxu2 %v968_v14  ;;  %1065 = vmatmul.f32.gmra.mxu1 %v2977_v48 }
 0x236   : > { %1206 = vmatmul.f32.gmra.mxu3 %v983_v15 }
 0x238   : > { %v870_v17 = vpop.f32.mrf.mxu0 }
 0x239   : > { %v902_v19 = vadd.f32 %v870_v17, %v2563_v11  ;;  %v2205_v17 = vld [vmem:[%s3505_s3 + $0x3f8] sm:$0xff] }
 0x23a   : > { %1495 = vmatpush.msra.mxu1 %v2205_v17 }
 0x23b   : > { %v2986_v53 = vadd.f32 %v2910_v30, %v902_v19 }
 0x23c   : > { %v969_v22 = vld [vmem:[#allocation2 + $0x3e] sm:$0xff] }
 0x23d   : > { %v984_v23 = vld [vmem:[#allocation2 + $0x3a] sm:$0xff]  ;;  %938 = vst [vmem:[#allocation2 + $0x48] sm:$0xff] %v2986_v53  ;;  %1130 = vmatmul.f32.gmra.mxu2 %v969_v22  ;;  %1068 = vmatmul.f32.gmra.mxu1 %v2986_v53 }
 0x23e   : > { %1209 = vmatmul.f32.gmra.mxu3 %v984_v23  ;;  %v3065_v22 = vld [vmem:[%s3506_s4 + $0x1] ss:$0 sm:$0xff]  ;;  %v2188_v23 = vld [vmem:[%s3505_s3 + $0x370] sm:$0xff] }
 0x240   : > { %v873_v31 = vpop.f32.mrf.mxu0 }
 0x241   : > { %v903_v24 = vadd.f32 %v873_v31, %v2579_v18 }
 0x243   : > { %v2995_v11 = vadd.f32 %v2910_v30, %v903_v24 }
 0x244   : > { %v970_v28 = vld [vmem:[#allocation2 + $0x46] sm:$0xff] }
 0x245   : > { %v985_v29 = vld [vmem:[#allocation2 + $0x42] sm:$0xff]  ;;  %939 = vst [vmem:[#allocation2 + $0x50] sm:$0xff] %v2995_v11  ;;  %1133 = vmatmul.f32.gmra.mxu2 %v970_v28  ;;  %1071 = vmatmul.f32.gmra.mxu1 %v2995_v11 }
 0x246   : > { %1212 = vmatmul.f32.gmra.mxu3 %v985_v29 }
 0x248   : > { %v876_v62 = vpop.f32.mrf.mxu0 }
 0x249   : > { %v904_v3 = vadd.f32 %v876_v62, %v2595_v25  ;;  %v2204_v62 = vld [vmem:[%s3505_s3 + $0x3f0] sm:$0xff] }
 0x24a   : > { %1496 = vmatpush.msra.mxu1 %v2204_v62 }
 0x24b   : > { %v3004_v18 = vadd.f32 %v2910_v30, %v904_v3 }
 0x24c   : > { %v971_v36 = vld [vmem:[#allocation2 + $0x4e] sm:$0xff] }
 0x24d   : > { %v986_v38 = vld [vmem:[#allocation2 + $0x4a] sm:$0xff]  ;;  %940 = vst [vmem:[#allocation2 + $0x58] sm:$0xff] %v3004_v18  ;;  %1136 = vmatmul.f32.gmra.mxu2 %v971_v36  ;;  %1074 = vmatmul.f32.gmra.mxu1 %v3004_v18 }
 0x24e   : > { %1215 = vmatmul.f32.gmra.mxu3 %v986_v38  ;;  %v2187_v38 = vld [vmem:[%s3505_s3 + $0x368] sm:$0xff] }
 0x250   : > { %v879_v7 = vpop.f32.mrf.mxu0 }
 0x251   : > { %v905_v41 = vadd.f32 %v879_v7, %v2611_v32 }
 0x253   : > { %v3013_v25 = vadd.f32 %v2910_v30, %v905_v41 }
 0x254   : > { %v972_v42 = vld [vmem:[#allocation2 + $0x56] sm:$0xff] }
 0x255   : > { %v987_v13 = vld [vmem:[#allocation2 + $0x52] sm:$0xff]  ;;  %941 = vst [vmem:[#allocation2 + $0x60] sm:$0xff] %v3013_v25  ;;  %1139 = vmatmul.f32.gmra.mxu2 %v972_v42  ;;  %1077 = vmatmul.f32.gmra.mxu1 %v3013_v25 }
 0x256   : > { %1218 = vmatmul.f32.gmra.mxu3 %v987_v13 }
 0x258   : > { %v882_v49 = vpop.f32.mrf.mxu0 }
 0x259   : > { %v906_v50 = vadd.f32 %v882_v49, %v2630_v40  ;;  %v2203_v49 = vld [vmem:[%s3505_s3 + $0x3e8] sm:$0xff] }
 0x25a   : > { %1497 = vmatpush.msra.mxu1 %v2203_v49 }
 0x25b   : > { %v3022_v32 = vadd.f32 %v2910_v30, %v906_v50 }
 0x25c   : > { %v973_v52 = vld [vmem:[#allocation2 + $0x5e] sm:$0xff] }
 0x25d   : > { %v988_v55 = vld [vmem:[#allocation2 + $0x5a] sm:$0xff]  ;;  %942 = vst [vmem:[#allocation2 + $0x68] sm:$0xff] %v3022_v32  ;;  %1142 = vmatmul.f32.gmra.mxu2 %v973_v52  ;;  %1080 = vmatmul.f32.gmra.mxu1 %v3022_v32 }
 0x25e   : > { %1221 = vmatmul.f32.gmra.mxu3 %v988_v55  ;;  %v2186_v55 = vld [vmem:[%s3505_s3 + $0x360] sm:$0xff] }
 0x260   : > { %v885_v59 = vpop.f32.mrf.mxu0 }
 0x261   : > { %v907_v60 = vadd.f32 %v885_v59, %v2643_v46  ;;  %v2157_v46 = vld [vmem:[%s3507_s5 + $0x80] sm:$0xff] }
 0x262   : > { %1325 = vmatpush.msra.mxu0 %v2157_v46 }
 0x263   : > { %v3031_v40 = vadd.f32 %v2910_v30, %v907_v60 }
 0x264   : > { %v974_v44 = vld [vmem:[#allocation2 + $0x66] sm:$0xff] }
 0x265   : > { %v989_v61 = vld [vmem:[#allocation2 + $0x62] sm:$0xff]  ;;  %943 = vst [vmem:[#allocation2 + $0x70] sm:$0xff] %v3031_v40  ;;  %1145 = vmatmul.f32.gmra.mxu2 %v974_v44  ;;  %1083 = vmatmul.f32.gmra.mxu1 %v3031_v40 }
 0x266   : > { %1224 = vmatmul.f32.gmra.mxu3 %v989_v61 }
 0x268   : > { %v888_v63 = vpop.f32.mrf.mxu0 }
 0x269   : > { %v908_v0 = vadd.f32 %v888_v63, %v2653_v51  ;;  %v2202_v63 = vld [vmem:[%s3505_s3 + $0x3e0] sm:$0xff] }
 0x26a   : > { %1498 = vmatpush.msra.mxu1 %v2202_v63 }
 0x26b   : > { %v3043_v1 = vadd.f32 %v2910_v30, %v908_v0 }
 0x26c   : > { %v975_v2 = vld [vmem:[#allocation2 + $0x6e] sm:$0xff] }
 0x26d   : > { %v990_v4 = vld [vmem:[#allocation2 + $0x6a] sm:$0xff]  ;;  %944 = vst [vmem:[#allocation2 + $0x78] sm:$0xff] %v3043_v1  ;;  %1148 = vmatmul.f32.gmra.mxu2 %v975_v2  ;;  %1086 = vmatmul.f32.gmra.mxu1 %v3043_v1  ;;  %v2185_v2 = vld [vmem:[%s3505_s3 + $0x358] sm:$0xff] }
 0x26e   : > { %1227 = vmatmul.f32.gmra.mxu3 %v990_v4 }
 0x270   : > { %v891_v5 = vpop.f32.mrf.mxu0 }
 0x271   : > { %v909_v6 = vadd.f32 %v891_v5, %v2663_v56  ;;  %v2189_v56 = vld [vmem:[%s3505_s3 + $0x378] sm:$0xff] }
 0x272   : > { %1560 = vmatpush.msrb.mxu2 %v2189_v56 }
 0x273   : > { %v3049_v51 = vadd.f32 %v2910_v30, %v909_v6 }
 0x274   : > { %v976_v8 = vld [vmem:[#allocation2 + $0x76] sm:$0xff]  ;;  %1561 = vmatpush.msrb.mxu2 %v2188_v23 }
 0x275   : > { %v991_v9 = vld [vmem:[#allocation2 + $0x72] sm:$0xff]  ;;  %945 = vst [vmem:[#allocation2 + $0x80] sm:$0xff] %v3049_v51  ;;  %1151 = vmatmul.f32.gmra.mxu2 %v976_v8  ;;  %1089 = vmatmul.f32.gmra.mxu1 %v3049_v51 }
 0x276   : > { %1230 = vmatmul.f32.gmra.mxu3 %v991_v9  ;;  %1562 = vmatpush.msrb.mxu2 %v2187_v38  ;;  %v2216_v23 = vld [vmem:[%s3505_s3 + $0x450] sm:$0xff]  ;;  %v2199_v38 = vld [vmem:[%s3505_s3 + $0x3c8] sm:$0xff] }
 0x278   : > { %1563 = vmatpush.msrb.mxu2 %v2186_v55  ;;  %v2198_v55 = vld [vmem:[%s3505_s3 + $0x3c0] sm:$0xff] }
 0x27a   : > { %v1045_v54 = vpop.f32.mrf.mxu1  ;;  %1564 = vmatpush.msrb.mxu2 %v2185_v2  ;;  %v2197_v2 = vld [vmem:[%s3505_s3 + $0x3b8] sm:$0xff] }
 0x27c   : > { %v977_v26 = vld [vmem:[#allocation2 + $0x7e] sm:$0xff] }
 0x27d   : > { %v992_v10 = vld [vmem:[#allocation2 + $0x7a] sm:$0xff]  ;;  %1154 = vmatmul.f32.gmra.mxu2 %v977_v26  ;;  %v993_v14 = vld [vmem:[#allocation2 + $0x82] sm:$0xff] }
 0x27e   : > { %1233 = vmatmul.f32.gmra.mxu3 %v992_v10  ;;  %v2201_v26 = vld [vmem:[%s3505_s3 + $0x3d8] sm:$0xff] }
 0x27f   : > { %1499 = vmatpush.msra.mxu1 %v2201_v26 }
 0x282   : > { %v1048_v12 = vpop.f32.mrf.mxu1 }
 0x286   : > { %1236 = vmatmul.f32.gmra.mxu3 %v993_v14  ;;  %v2184_v14 = vld [vmem:[%s3505_s3 + $0x350] sm:$0xff] }
 0x287   : > { %1565 = vmatpush.msrb.mxu2 %v2184_v14  ;;  %v2196_v14 = vld [vmem:[%s3505_s3 + $0x3b0] sm:$0xff] }
 0x288   : > { %v1110_v30 = vpop.f32.mrf.mxu2 }
 0x289   : > { %v1111_v19 = vadd.f32 %v1110_v30, %v1045_v54  ;;  %v2217_v54 = vld [vmem:[%s3505_s3 + $0x458] sm:$0xff] }
 0x28a   : > { %v1051_v15 = vpop.f32.mrf.mxu1  ;;  %1646 = vmatpush.msrb.mxu3 %v2217_v54 }
 0x28c   : > { %1647 = vmatpush.msrb.mxu3 %v2216_v23 }
 0x290   : > { %v1113_v58 = vpop.f32.mrf.mxu2 }
 0x291   : > { %v1192_v31 = vpop.f32.mrf.mxu3  ;;  %v1114_v36 = vadd.f32 %v1113_v58, %v1048_v12  ;;  %v2200_v58 = vld [vmem:[%s3505_s3 + $0x3d0] sm:$0xff] }
 0x292   : > { %v1240_v24 = vadd.f32 %v1192_v31, %v1111_v19  ;;  %v1054_v29 = vpop.f32.mrf.mxu1  ;;  %1500 = vmatpush.msra.mxu1 %v2200_v58 }
 0x294   : > { %v1261_v28 = vadd.f32 %v3065_v22, %v1240_v24  ;;  %v2183_v24 = vld [vmem:[%s3505_s3 + $0x348] sm:$0xff]  ;;  %1501 = vmatpush.msra.mxu1 %v2199_v38 }
 0x295   : > { %1566 = vmatpush.msrb.mxu2 %v2183_v24  ;;  %v2195_v24 = vld [vmem:[%s3505_s3 + $0x3a8] sm:$0xff] }
 0x296   : > { %v1277_v3 = vmax.f32 %v1261_v28, 0.0  ;;  %1502 = vmatpush.msra.mxu1 %v2198_v55 }
 0x298   : > { %1326 = vmatmul.f32.vlgmr.msra.gmra.mxu0 %v1277_v3  ;;  %v1116_v37 = vpop.f32.mrf.mxu2  ;;  %1503 = vmatpush.msra.mxu1 %v2197_v2 }
 0x299   : > { %v1195_v7 = vpop.f32.mrf.mxu3  ;;  %v1117_v52 = vadd.f32 %v1116_v37, %v1051_v15 }
 0x29a   : > { %v1241_v41 = vadd.f32 %v1195_v7, %v1114_v36  ;;  %v1057_v13 = vpop.f32.mrf.mxu1  ;;  %v2215_v36 = vld [vmem:[%s3505_s3 + $0x448] sm:$0xff]  ;;  %1504 = vmatpush.msra.mxu1 %v2196_v14 }
 0x29b   : > { %1648 = vmatpush.msrb.mxu3 %v2215_v36 }
 0x29c   : > { %v1262_v42 = vadd.f32 %v3065_v22, %v1241_v41  ;;  %v2182_v41 = vld [vmem:[%s3505_s3 + $0x340] sm:$0xff]  ;;  %1505 = vmatpush.msra.mxu1 %v2195_v24 }
 0x29d   : > { %1567 = vmatpush.msrb.mxu2 %v2182_v41 }
 0x29e   : > { %v1278_v50 = vmax.f32 %v1262_v42, 0.0 }
 0x2a0   : > { %1329 = vmatmul.f32.gmra.mxu0 %v1278_v50  ;;  %v1119_v57 = vpop.f32.mrf.mxu2 }
 0x2a1   : > { %v1198_v59 = vpop.f32.mrf.mxu3  ;;  %v1120_v46 = vadd.f32 %v1119_v57, %v1054_v29 }
 0x2a2   : > { %v1242_v60 = vadd.f32 %v1198_v59, %v1117_v52  ;;  %v1060_v61 = vpop.f32.mrf.mxu1  ;;  %v2214_v52 = vld [vmem:[%s3505_s3 + $0x440] sm:$0xff]  ;;  %v2181_v59 = vld [vmem:[%s3505_s3 + $0x338] sm:$0xff] }
 0x2a3   : > { %1649 = vmatpush.msrb.mxu3 %v2214_v52  ;;  %1568 = vmatpush.msrb.mxu2 %v2181_v59  ;;  %v2193_v59 = vld [vmem:[%s3505_s3 + $0x398] sm:$0xff] }
 0x2a4   : > { %v1263_v44 = vadd.f32 %v3065_v22, %v1242_v60 }
 0x2a6   : > { %v1279_v0 = vmax.f32 %v1263_v44, 0.0 }
 0x2a8   : > { %1332 = vmatmul.f32.gmra.mxu0 %v1279_v0  ;;  %v1122_v4 = vpop.f32.mrf.mxu2 }
 0x2a9   : > { %v1201_v5 = vpop.f32.mrf.mxu3  ;;  %v1123_v12 = vadd.f32 %v1122_v4, %v1057_v13 }
 0x2aa   : > { %v1243_v6 = vadd.f32 %v1201_v5, %v1120_v46  ;;  %v1063_v9 = vpop.f32.mrf.mxu1  ;;  %v2213_v46 = vld [vmem:[%s3505_s3 + $0x438] sm:$0xff]  ;;  %v2180_v5 = vld [vmem:[%s3505_s3 + $0x330] sm:$0xff] }
 0x2ab   : > { %1650 = vmatpush.msrb.mxu3 %v2213_v46  ;;  %1569 = vmatpush.msrb.mxu2 %v2180_v5 }
 0x2ac   : > { %v1264_v8 = vadd.f32 %v3065_v22, %v1243_v6 }
 0x2ae   : > { %v1280_v10 = vmax.f32 %v1264_v8, 0.0 }
 0x2b0   : > { %1335 = vmatmul.f32.gmra.mxu0 %v1280_v10  ;;  %v1125_v56 = vpop.f32.mrf.mxu2 }
 0x2b1   : > { %v1204_v30 = vpop.f32.mrf.mxu3  ;;  %v1126_v31 = vadd.f32 %v1125_v56, %v1060_v61 }
 0x2b2   : > { %v1244_v15 = vadd.f32 %v1204_v30, %v1123_v12  ;;  %v1066_v19 = vpop.f32.mrf.mxu1  ;;  %v2212_v12 = vld [vmem:[%s3505_s3 + $0x430] sm:$0xff]  ;;  %v2179_v30 = vld [vmem:[%s3505_s3 + $0x328] sm:$0xff] }
 0x2b3   : > { %1651 = vmatpush.msrb.mxu3 %v2212_v12  ;;  %1570 = vmatpush.msrb.mxu2 %v2179_v30  ;;  %v2207_v12 = vld [vmem:[%s3505_s3 + $0x408] sm:$0xff] }
 0x2b4   : > { %v1265_v16 = vadd.f32 %v3065_v22, %v1244_v15 }
 0x2b6   : > { %v1281_v17 = vmax.f32 %v1265_v16, 0.0 }
 0x2b8   : > { %1338 = vmatmul.f32.gmra.mxu0 %v1281_v17  ;;  %v1128_v28 = vpop.f32.mrf.mxu2 }
 0x2b9   : > { %v1207_v29 = vpop.f32.mrf.mxu3  ;;  %v1129_v37 = vadd.f32 %v1128_v28, %v1063_v9 }
 0x2ba   : > { %v1245_v33 = vadd.f32 %v1207_v29, %v1126_v31  ;;  %v1069_v7 = vpop.f32.mrf.mxu1  ;;  %v2211_v31 = vld [vmem:[%s3505_s3 + $0x428] sm:$0xff]  ;;  %v2178_v29 = vld [vmem:[%s3505_s3 + $0x320] sm:$0xff] }
 0x2bb   : > { %1652 = vmatpush.msrb.mxu3 %v2211_v31  ;;  %1571 = vmatpush.msrb.mxu2 %v2178_v29 }
 0x2bc   : > { %v1266_v62 = vadd.f32 %v3065_v22, %v1245_v33 }
 0x2be   : > { %v1282_v3 = vmax.f32 %v1266_v62, 0.0 }
 0x2c0   : > { %1341 = vmatmul.f32.gmra.mxu0 %v1282_v3  ;;  %v1131_v42 = vpop.f32.mrf.mxu2 }
 0x2c1   : > { %v1210_v13 = vpop.f32.mrf.mxu3  ;;  %v1132_v57 = vadd.f32 %v1131_v42, %v1066_v19 }
 0x2c2   : > { %v1246_v47 = vadd.f32 %v1210_v13, %v1129_v37  ;;  %v1072_v21 = vpop.f32.mrf.mxu1  ;;  %v2210_v37 = vld [vmem:[%s3505_s3 + $0x420] sm:$0xff]  ;;  %v2177_v13 = vld [vmem:[%s3505_s3 + $0x318] sm:$0xff] }
 0x2c3   : > { %1653 = vmatpush.msrb.mxu3 %v2210_v37  ;;  %1572 = vmatpush.msrb.mxu2 %v2177_v13  ;;  %v2238_v37 = vld [vmem:[%s3507_s5 + $0x178] sm:$0xff] }
 0x2c4   : > { %v1267_v49 = vadd.f32 %v3065_v22, %v1246_v47  ;;  %1777 = vmatpush.msrb.mxu0 %v2238_v37 }
 0x2c6   : > { %v1283_v50 = vmax.f32 %v1267_v49, 0.0 }
 0x2c8   : > { %1344 = vmatmul.f32.gmra.mxu0 %v1283_v50  ;;  %v1134_v60 = vpop.f32.mrf.mxu2 }
 0x2c9   : > { %v1213_v44 = vpop.f32.mrf.mxu3  ;;  %v1135_v4 = vadd.f32 %v1134_v60, %v1069_v7  ;;  %v2194_v7 = vld [vmem:[%s3505_s3 + $0x3a0] sm:$0xff] }
 0x2ca   : > { %v1247_v61 = vadd.f32 %v1213_v44, %v1132_v57  ;;  %v1075_v26 = vpop.f32.mrf.mxu1  ;;  %1506 = vmatpush.msra.mxu1 %v2194_v7  ;;  %v2209_v57 = vld [vmem:[%s3505_s3 + $0x418] sm:$0xff]  ;;  %v2176_v44 = vld [vmem:[%s3505_s3 + $0x310] sm:$0xff]  ;;  %v3224_v7 = vld [vmem:[%s3508_s6 + $0x1] ss:$0 sm:$0xff] }
 0x2cb   : > { %1654 = vmatpush.msrb.mxu3 %v2209_v57  ;;  %1573 = vmatpush.msrb.mxu2 %v2176_v44 }
 0x2cc   : > { %v1268_v63 = vadd.f32 %v3065_v22, %v1247_v61  ;;  %1507 = vmatpush.msra.mxu1 %v2193_v59  ;;  %v2208_v61 = vld [vmem:[%s3505_s3 + $0x410] sm:$0xff] }
 0x2cd   : > { %1655 = vmatpush.msrb.mxu3 %v2208_v61 }
 0x2ce   : > { %v1284_v0 = vmax.f32 %v1268_v63, 0.0 }
 0x2cf   : > { %1656 = vmatpush.msrb.mxu3 %v2207_v12  ;;  %v2231_v12 = vld [vmem:[%s3507_s5 + $0x140] sm:$0xff] }
 0x2d0   : > { %1347 = vmatmul.f32.gmra.mxu0 %v1284_v0  ;;  %v1137_v6 = vpop.f32.mrf.mxu2 }
 0x2d1   : > { %v1216_v8 = vpop.f32.mrf.mxu3  ;;  %v1138_v56 = vadd.f32 %v1137_v6, %v1072_v21  ;;  %v2191_v6 = vld [vmem:[%s3505_s3 + $0x388] sm:$0xff] }
 0x2d2   : > { %v1248_v9 = vadd.f32 %v1216_v8, %v1135_v4  ;;  %v1078_v58 = vpop.f32.mrf.mxu1  ;;  %v2192_v4 = vld [vmem:[%s3505_s3 + $0x390] sm:$0xff] }
 0x2d3   : > { %1508 = vmatpush.msra.mxu1 %v2192_v4  ;;  %v2233_v4 = vld [vmem:[%s3507_s5 + $0x150] sm:$0xff] }
 0x2d4   : > { %v1269_v54 = vadd.f32 %v3065_v22, %v1248_v9 }
 0x2d5   : > { %1509 = vmatpush.msra.mxu1 %v2191_v6 }
 0x2d6   : > { %v1285_v10 = vmax.f32 %v1269_v54, 0.0  ;;  %v2190_v54 = vld [vmem:[%s3505_s3 + $0x380] sm:$0xff] }
 0x2d7   : > { %1510 = vmatpush.msra.mxu1 %v2190_v54 }
 0x2d8   : > { %1350 = vmatmul.f32.gmra.mxu0 %v1285_v10  ;;  %v1140_v15 = vpop.f32.mrf.mxu2  ;;  %v2175_v10 = vld [vmem:[%s3505_s3 + $0x308] sm:$0xff] }
 0x2d9   : > { %v1219_v16 = vpop.f32.mrf.mxu3  ;;  %v1141_v28 = vadd.f32 %v1140_v15, %v1075_v26  ;;  %1574 = vmatpush.msrb.mxu2 %v2175_v10 }
 0x2da   : > { %v1249_v17 = vadd.f32 %v1219_v16, %v1138_v56  ;;  %v1081_v42 = vpop.f32.mrf.mxu1 }
 0x2dc   : > { %v1270_v19 = vadd.f32 %v3065_v22, %v1249_v17 }
 0x2de   : > { %v1286_v23 = vmax.f32 %v1270_v19, 0.0  ;;  %v2174_v19 = vld [vmem:[%s3505_s3 + $0x300] sm:$0xff] }
 0x2df   : > { %1575 = vmatpush.msrb.mxu2 %v2174_v19 }
 0x2e0   : > { %1353 = vmatmul.f32.gmra.mxu0 %v1286_v23  ;;  %v1143_v33 = vpop.f32.mrf.mxu2 }
 0x2e1   : > { %v1222_v62 = vpop.f32.mrf.mxu3  ;;  %v1144_v41 = vadd.f32 %v1143_v33, %v1078_v58  ;;  %v2206_v58 = vld [vmem:[%s3505_s3 + $0x400] sm:$0xff] }
 0x2e2   : > { %v1250_v3 = vadd.f32 %v1222_v62, %v1141_v28  ;;  %v1084_v46 = vpop.f32.mrf.mxu1  ;;  %1657 = vmatpush.msrb.mxu3 %v2206_v58 }
 0x2e4   : > { %v1271_v36 = vadd.f32 %v3065_v22, %v1250_v3 }
 0x2e6   : > { %v1287_v38 = vmax.f32 %v1271_v36, 0.0 }
 0x2e8   : > { %1356 = vmatmul.f32.gmra.mxu0 %v1287_v38  ;;  %v1146_v47 = vpop.f32.mrf.mxu2 }
 0x2e9   : > { %v1225_v49 = vpop.f32.mrf.mxu3  ;;  %v1147_v60 = vadd.f32 %v1146_v47, %v1081_v42 }
 0x2ea   : > { %v1251_v50 = vadd.f32 %v1225_v49, %v1144_v41  ;;  %v1087_v30 = vpop.f32.mrf.mxu1 }
 0x2ec   : > { %v1272_v52 = vadd.f32 %v3065_v22, %v1251_v50 }
 0x2ee   : > { %v1288_v55 = vmax.f32 %v1272_v52, 0.0 }
 0x2f0   : > { %1359 = vmatmul.f32.gmra.mxu0 %v1288_v55  ;;  %v1149_v21 = vpop.f32.mrf.mxu2 }
 0x2f1   : > { %v1228_v63 = vpop.f32.mrf.mxu3  ;;  %v1150_v8 = vadd.f32 %v1149_v21, %v1084_v46 }
 0x2f2   : > { %v1252_v0 = vadd.f32 %v1228_v63, %v1147_v60  ;;  %v1090_v29 = vpop.f32.mrf.mxu1  ;;  %v2235_v60 = vld [vmem:[%s3507_s5 + $0x160] sm:$0xff]  ;;  %v2234_v63 = vld [vmem:[%s3507_s5 + $0x158] sm:$0xff] }
 0x2f4   : > { %v1273_v2 = vadd.f32 %v3065_v22, %v1252_v0 }
 0x2f6   : > { %v1289_v5 = vmax.f32 %v1273_v2, 0.0 }
 0x2f8   : > { %1362 = vmatmul.f32.gmra.mxu0 %v1289_v5  ;;  %v1152_v14 = vpop.f32.mrf.mxu2 }
 0x2f9   : > { %v1231_v9 = vpop.f32.mrf.mxu3  ;;  %v1153_v16 = vadd.f32 %v1152_v14, %v1087_v30 }
 0x2fa   : > { %v1253_v26 = vadd.f32 %v1231_v9, %v1150_v8  ;;  %v2232_v9 = vld [vmem:[%s3507_s5 + $0x148] sm:$0xff] }
 0x2fc   : > { %v1274_v56 = vadd.f32 %v3065_v22, %v1253_v26 }
 0x2fe   : > { %v1290_v15 = vmax.f32 %v1274_v56, 0.0 }
 0x300   : > { %1365 = vmatmul.f32.gmra.mxu0 %v1290_v15  ;;  %v1155_v24 = vpop.f32.mrf.mxu2  ;;  %v2230_v15 = vld [vmem:[%s3507_s5 + $0x138] sm:$0xff] }
 0x301   : > { %v1234_v17 = vpop.f32.mrf.mxu3  ;;  %v1156_v33 = vadd.f32 %v1155_v24, %v1090_v29 }
 0x302   : > { %v1254_v23 = vadd.f32 %v1234_v17, %v1153_v16 }
 0x304   : > { %v1275_v31 = vadd.f32 %v3065_v22, %v1254_v23  ;;  %v2229_v23 = vld [vmem:[%s3507_s5 + $0x130] sm:$0xff] }
 0x306   : > { %v1291_v28 = vmax.f32 %v1275_v31, 0.0 }
 0x308   : > { %1368 = vmatmul.f32.gmra.mxu0 %v1291_v28  ;;  %v2228_v28 = vld [vmem:[%s3507_s5 + $0x128] sm:$0xff] }
 0x309   : > { %v1237_v62 = vpop.f32.mrf.mxu3 }
 0x30a   : > { %v1255_v3 = vadd.f32 %v1237_v62, %v1156_v33 }
 0x30c   : > { %v1276_v36 = vadd.f32 %v3065_v22, %v1255_v3  ;;  %v2237_v22 = vld [vmem:[%s3507_s5 + $0x170] sm:$0xff]  ;;  %v2227_v3 = vld [vmem:[%s3507_s5 + $0x120] sm:$0xff] }
 0x30d   : > { %1778 = vmatpush.msrb.mxu0 %v2237_v22 }
 0x30e   : > { %v1292_v38 = vmax.f32 %v1276_v36, 0.0 }
 0x310   : > { %1371 = vmatmul.f32.gmra.mxu0 %v1292_v38 }
 0x315   : > { %v1327_v41 = vpop.f32.mrf.mxu0 }
 0x316   : > { %v1375_v42 = vadd.f32 %v1327_v41, %v2914_v35  ;;  %v2236_v35 = vld [vmem:[%s3507_s5 + $0x168] sm:$0xff]  ;;  %v2226_v41 = vld [vmem:[%s3507_s5 + $0x118] sm:$0xff] }
 0x317   : > { %1779 = vmatpush.msrb.mxu0 %v2236_v35 }
 0x318   : > { %v3228_v13 = vadd.f32 %v3224_v7, %v1375_v42 }
 0x319   : > { %1780 = vmatpush.msrb.mxu0 %v2235_v60 }
 0x31a   : > { %1412 = vst [vmem:[#allocation2 + $0x8] sm:$0xff] %v3228_v13  ;;  %1511 = vmatmul.f32.vlgmr.msra.gmra.mxu1 %v3228_v13 }
 0x31b   : > { %1781 = vmatpush.msrb.mxu0 %v2234_v63 }
 0x31d   : > { %v1330_v47 = vpop.f32.mrf.mxu0  ;;  %1782 = vmatpush.msrb.mxu0 %v2233_v4 }
 0x31e   : > { %v1376_v49 = vadd.f32 %v1330_v47, %v2923_v39 }
 0x31f   : > { %1783 = vmatpush.msrb.mxu0 %v2232_v9 }
 0x320   : > { %v3237_v50 = vadd.f32 %v3224_v7, %v1376_v49  ;;  %v2225_v49 = vld [vmem:[%s3507_s5 + $0x110] sm:$0xff] }
 0x321   : > { %v1444_v52 = vld [vmem:[#allocation2 + $0x4] sm:$0xff]  ;;  %1784 = vmatpush.msrb.mxu0 %v2231_v12 }
 0x322   : > { %1413 = vst [vmem:[#allocation2 + $0x10] sm:$0xff] %v3237_v50  ;;  %1576 = vmatmul.f32.vlgmr.msrb.gmra.mxu2 %v1444_v52  ;;  %1514 = vmatmul.f32.gmra.mxu1 %v3237_v50 }
 0x323   : > { %1785 = vmatpush.msrb.mxu0 %v2230_v15  ;;  %v1924_v15 = vld [vmem:[%s3509_s7 + $0x68] sm:$0xff] }
 0x325   : > { %v1333_v55 = vpop.f32.mrf.mxu0  ;;  %1786 = vmatpush.msrb.mxu0 %v2229_v23 }
 0x326   : > { %v1377_v57 = vadd.f32 %v1333_v55, %v2932_v45 }
 0x327   : > { %1787 = vmatpush.msrb.mxu0 %v2228_v28  ;;  %v1923_v28 = vld [vmem:[%s3509_s7 + $0x60] sm:$0xff] }
 0x328   : > { %v3246_v59 = vadd.f32 %v3224_v7, %v1377_v57  ;;  %v2224_v57 = vld [vmem:[%s3507_s5 + $0x108] sm:$0xff] }
 0x329   : > { %v1445_v39 = vld [vmem:[#allocation2 + $0xc] sm:$0xff]  ;;  %1788 = vmatpush.msrb.mxu0 %v2227_v3 }
 0x32a   : > { %1414 = vst [vmem:[#allocation2 + $0x18] sm:$0xff] %v3246_v59  ;;  %1579 = vmatmul.f32.gmra.mxu2 %v1445_v39  ;;  %1658 = vmatmul.f32.vlgmr.msrb.gmra.mxu3 %v1445_v39 }
 0x32b   : > { %1517 = vmatmul.f32.gmra.mxu1 %v3246_v59  ;;  %1789 = vmatpush.msrb.mxu0 %v2226_v41  ;;  %v1922_v41 = vld [vmem:[%s3509_s7 + $0x58] sm:$0xff] }
 0x32d   : > { %v1336_v44 = vpop.f32.mrf.mxu0  ;;  %1790 = vmatpush.msrb.mxu0 %v2225_v49 }
 0x32e   : > { %v1378_v61 = vadd.f32 %v1336_v44, %v2941_v20 }
 0x32f   : > { %1791 = vmatpush.msrb.mxu0 %v2224_v57  ;;  %v1921_v57 = vld [vmem:[%s3509_s7 + $0x50] sm:$0xff] }
 0x330   : > { %v3255_v45 = vadd.f32 %v3224_v7, %v1378_v61 }
 0x331   : > { %v1446_v21 = vld [vmem:[#allocation2 + $0x14] sm:$0xff] }
 0x332   : > { %1415 = vst [vmem:[#allocation2 + $0x20] sm:$0xff] %v3255_v45  ;;  %1582 = vmatmul.f32.gmra.mxu2 %v1446_v21  ;;  %1661 = vmatmul.f32.gmra.mxu3 %v1446_v21 }
 0x333   : > { %1520 = vmatmul.f32.gmra.mxu1 %v3255_v45 }
 0x335   : > { %v1339_v0 = vpop.f32.mrf.mxu0 }
 0x336   : > { %v1379_v46 = vadd.f32 %v1339_v0, %v2950_v27 }
 0x338   : > { %v3264_v20 = vadd.f32 %v3224_v7, %v1379_v46 }
 0x339   : > { %v1447_v2 = vld [vmem:[#allocation2 + $0x1c] sm:$0xff] }
 0x33a   : > { %1416 = vst [vmem:[#allocation2 + $0x28] sm:$0xff] %v3264_v20  ;;  %1585 = vmatmul.f32.gmra.mxu2 %v1447_v2  ;;  %1664 = vmatmul.f32.gmra.mxu3 %v1447_v2 }
 0x33b   : > { %1523 = vmatmul.f32.gmra.mxu1 %v3264_v20 }
 0x33d   : > { %v1342_v5 = vpop.f32.mrf.mxu0 }
 0x33e   : > { %v1380_v6 = vadd.f32 %v1342_v5, %v2959_v34 }
 0x340   : > { %v3273_v27 = vadd.f32 %v3224_v7, %v1380_v6 }
 0x341   : > { %v1448_v8 = vld [vmem:[#allocation2 + $0x24] sm:$0xff] }
 0x342   : > { %1417 = vst [vmem:[#allocation2 + $0x30] sm:$0xff] %v3273_v27  ;;  %1588 = vmatmul.f32.gmra.mxu2 %v1448_v8  ;;  %1667 = vmatmul.f32.gmra.mxu3 %v1448_v8  ;;  %v1925_v8 = vld [vmem:[%s3509_s7 + $0x70] sm:$0xff] }
 0x343   : > { %1526 = vmatmul.f32.gmra.mxu1 %v3273_v27 }
 0x345   : > { %v1345_v54 = vpop.f32.mrf.mxu0 }
 0x346   : > { %v1381_v26 = vadd.f32 %v1345_v54, %v2968_v43  ;;  %v3376_v54 = vld [vmem:[%s3506_s4 + $0x2] ss:$0 sm:$0xff] }
 0x348   : > { %v3282_v34 = vadd.f32 %v3224_v7, %v1381_v26 }
 0x349   : > { %v1449_v10 = vld [vmem:[#allocation2 + $0x2c] sm:$0xff] }
 0x34a   : > { %1418 = vst [vmem:[#allocation2 + $0x38] sm:$0xff] %v3282_v34  ;;  %1591 = vmatmul.f32.gmra.mxu2 %v1449_v10  ;;  %1670 = vmatmul.f32.gmra.mxu3 %v1449_v10 }
 0x34b   : > { %1529 = vmatmul.f32.gmra.mxu1 %v3282_v34 }
 0x34d   : > { %v1348_v14 = vpop.f32.mrf.mxu0 }
 0x34e   : > { %v1382_v56 = vadd.f32 %v1348_v14, %v2977_v48 }
 0x350   : > { %v3291_v43 = vadd.f32 %v3224_v7, %v1382_v56 }
 0x351   : > { %v1450_v30 = vld [vmem:[#allocation2 + $0x34] sm:$0xff] }
 0x352   : > { %1419 = vst [vmem:[#allocation2 + $0x40] sm:$0xff] %v3291_v43  ;;  %1594 = vmatmul.f32.gmra.mxu2 %v1450_v30  ;;  %1673 = vmatmul.f32.gmra.mxu3 %v1450_v30 }
 0x353   : > { %1532 = vmatmul.f32.gmra.mxu1 %v3291_v43 }
 0x355   : > { %v1351_v16 = vpop.f32.mrf.mxu0 }
 0x356   : > { %v1383_v17 = vadd.f32 %v1351_v16, %v2986_v53 }
 0x358   : > { %v3300_v48 = vadd.f32 %v3224_v7, %v1383_v17 }
 0x359   : > { %v1451_v19 = vld [vmem:[#allocation2 + $0x3c] sm:$0xff] }
 0x35a   : > { %1420 = vst [vmem:[#allocation2 + $0x48] sm:$0xff] %v3300_v48  ;;  %1597 = vmatmul.f32.gmra.mxu2 %v1451_v19  ;;  %1676 = vmatmul.f32.gmra.mxu3 %v1451_v19 }
 0x35b   : > { %1535 = vmatmul.f32.gmra.mxu1 %v3300_v48 }
 0x35d   : > { %v1354_v58 = vpop.f32.mrf.mxu0 }
 0x35e   : > { %v1384_v31 = vadd.f32 %v1354_v58, %v2995_v11 }
 0x360   : > { %v3309_v53 = vadd.f32 %v3224_v7, %v1384_v31 }
 0x361   : > { %v1452_v24 = vld [vmem:[#allocation2 + $0x44] sm:$0xff] }
 0x362   : > { %1421 = vst [vmem:[#allocation2 + $0x50] sm:$0xff] %v3309_v53  ;;  %1600 = vmatmul.f32.gmra.mxu2 %v1452_v24  ;;  %1679 = vmatmul.f32.gmra.mxu3 %v1452_v24 }
 0x363   : > { %1538 = vmatmul.f32.gmra.mxu1 %v3309_v53 }
 0x365   : > { %v1357_v29 = vpop.f32.mrf.mxu0 }
 0x366   : > { %v1385_v33 = vadd.f32 %v1357_v29, %v3004_v18 }
 0x368   : > { %v3318_v11 = vadd.f32 %v3224_v7, %v1385_v33 }
 0x369   : > { %v1453_v62 = vld [vmem:[#allocation2 + $0x4c] sm:$0xff] }
 0x36a   : > { %1422 = vst [vmem:[#allocation2 + $0x58] sm:$0xff] %v3318_v11  ;;  %1603 = vmatmul.f32.gmra.mxu2 %v1453_v62  ;;  %1682 = vmatmul.f32.gmra.mxu3 %v1453_v62 }
 0x36b   : > { %1541 = vmatmul.f32.gmra.mxu1 %v3318_v11 }
 0x36d   : > { %v1360_v36 = vpop.f32.mrf.mxu0 }
 0x36e   : > { %v1386_v38 = vadd.f32 %v1360_v36, %v3013_v25 }
 0x370   : > { %v3327_v18 = vadd.f32 %v3224_v7, %v1386_v38 }
 0x371   : > { %v1454_v37 = vld [vmem:[#allocation2 + $0x54] sm:$0xff] }
 0x372   : > { %1423 = vst [vmem:[#allocation2 + $0x60] sm:$0xff] %v3327_v18  ;;  %1606 = vmatmul.f32.gmra.mxu2 %v1454_v37  ;;  %1685 = vmatmul.f32.gmra.mxu3 %v1454_v37 }
 0x373   : > { %1544 = vmatmul.f32.gmra.mxu1 %v3327_v18 }
 0x375   : > { %v1363_v42 = vpop.f32.mrf.mxu0 }
 0x376   : > { %v1387_v22 = vadd.f32 %v1363_v42, %v3022_v32 }
 0x378   : > { %v3336_v25 = vadd.f32 %v3224_v7, %v1387_v22 }
 0x379   : > { %v1455_v47 = vld [vmem:[#allocation2 + $0x5c] sm:$0xff] }
 0x37a   : > { %1424 = vst [vmem:[#allocation2 + $0x68] sm:$0xff] %v3336_v25  ;;  %1609 = vmatmul.f32.gmra.mxu2 %v1455_v47  ;;  %1688 = vmatmul.f32.gmra.mxu3 %v1455_v47 }
 0x37b   : > { %1547 = vmatmul.f32.gmra.mxu1 %v3336_v25 }
 0x37d   : > { %v1366_v52 = vpop.f32.mrf.mxu0 }
 0x37e   : > { %v1388_v35 = vadd.f32 %v1366_v52, %v3031_v40  ;;  %v2223_v40 = vld [vmem:[%s3507_s5 + $0x100] sm:$0xff] }
 0x37f   : > { %1792 = vmatpush.msrb.mxu0 %v2223_v40 }
 0x380   : > { %v3345_v32 = vadd.f32 %v3224_v7, %v1388_v35 }
 0x381   : > { %v1456_v55 = vld [vmem:[#allocation2 + $0x64] sm:$0xff] }
 0x382   : > { %1425 = vst [vmem:[#allocation2 + $0x70] sm:$0xff] %v3345_v32  ;;  %1612 = vmatmul.f32.gmra.mxu2 %v1456_v55  ;;  %1691 = vmatmul.f32.gmra.mxu3 %v1456_v55 }
 0x383   : > { %1550 = vmatmul.f32.gmra.mxu1 %v3345_v32 }
 0x385   : > { %v1369_v39 = vpop.f32.mrf.mxu0 }
 0x386   : > { %v1389_v60 = vadd.f32 %v1369_v39, %v3043_v1 }
 0x388   : > { %v3357_v44 = vadd.f32 %v3224_v7, %v1389_v60 }
 0x389   : > { %v1457_v61 = vld [vmem:[#allocation2 + $0x6c] sm:$0xff] }
 0x38a   : > { %1426 = vst [vmem:[#allocation2 + $0x78] sm:$0xff] %v3357_v44  ;;  %1615 = vmatmul.f32.gmra.mxu2 %v1457_v61  ;;  %1694 = vmatmul.f32.gmra.mxu3 %v1457_v61 }
 0x38b   : > { %1553 = vmatmul.f32.gmra.mxu1 %v3357_v44 }
 0x38d   : > { %v1372_v21 = vpop.f32.mrf.mxu0 }
 0x38e   : > { %v1390_v63 = vadd.f32 %v1372_v21, %v3049_v51  ;;  %v1926_v51 = vld [vmem:[%s3509_s7 + $0x78] sm:$0xff] }
 0x38f   : > { %1931 = vmatpush.msrb.mxu1 %v1926_v51 }
 0x390   : > { %v3363_v1 = vadd.f32 %v3224_v7, %v1390_v63 }
 0x391   : > { %v1458_v0 = vld [vmem:[#allocation2 + $0x74] sm:$0xff]  ;;  %1932 = vmatpush.msrb.mxu1 %v1925_v8  ;;  %v1919_v8 = vld [vmem:[%s3509_s7 + $0x40] sm:$0xff] }
 0x392   : > { %1427 = vst [vmem:[#allocation2 + $0x80] sm:$0xff] %v3363_v1  ;;  %1618 = vmatmul.f32.gmra.mxu2 %v1458_v0  ;;  %1697 = vmatmul.f32.gmra.mxu3 %v1458_v0 }
 0x393   : > { %1556 = vmatmul.f32.gmra.mxu1 %v3363_v1 }
 0x394   : > { %1933 = vmatpush.msrb.mxu1 %v1924_v15  ;;  %v1918_v15 = vld [vmem:[%s3509_s7 + $0x38] sm:$0xff] }
 0x396   : > { %1934 = vmatpush.msrb.mxu1 %v1923_v28  ;;  %v1917_v28 = vld [vmem:[%s3509_s7 + $0x30] sm:$0xff] }
 0x397   : > { %v1512_v46 = vpop.f32.mrf.mxu1 }
 0x398   : > { %1935 = vmatpush.msrb.mxu1 %v1922_v41  ;;  %v1916_v41 = vld [vmem:[%s3509_s7 + $0x28] sm:$0xff] }
 0x399   : > { %v1459_v2 = vld [vmem:[#allocation2 + $0x7c] sm:$0xff]  ;;  %v1460_v5 = vld [vmem:[#allocation2 + $0x84] sm:$0xff] }
 0x39a   : > { %1621 = vmatmul.f32.gmra.mxu2 %v1459_v2  ;;  %1700 = vmatmul.f32.gmra.mxu3 %v1459_v2 }
 0x39b   : > { %1936 = vmatpush.msrb.mxu1 %v1921_v57  ;;  %v1915_v57 = vld [vmem:[%s3509_s7 + $0x20] sm:$0xff] }
 0x39f   : > { %v1515_v4 = vpop.f32.mrf.mxu1 }
 0x3a2   : > { %1703 = vmatmul.f32.gmra.mxu3 %v1460_v5 }
 0x3a5   : > { %v1577_v7 = vpop.f32.mrf.mxu2 }
 0x3a6   : > { %v1578_v9 = vadd.f32 %v1577_v7, %v1512_v46  ;;  %v1920_v46 = vld [vmem:[%s3509_s7 + $0x48] sm:$0xff] }
 0x3a7   : > { %1937 = vmatpush.msrb.mxu1 %v1920_v46 }
 0x3a8   : > { %v1518_v6 = vpop.f32.mrf.mxu1 }
 0x3a9   : > { %1938 = vmatpush.msrb.mxu1 %v1919_v8  ;;  %v1913_v8 = vld [vmem:[%s3509_s7 + $0x10] sm:$0xff] }
 0x3ab   : > { %1939 = vmatpush.msrb.mxu1 %v1918_v15 }
 0x3ad   : > { %v1580_v26 = vpop.f32.mrf.mxu2  ;;  %v1659_v10 = vpop.f32.mrf.mxu3  ;;  %1940 = vmatpush.msrb.mxu1 %v1917_v28 }
 0x3ae   : > { %v1707_v12 = vadd.f32 %v1659_v10, %v1578_v9  ;;  %v1581_v16 = vadd.f32 %v1580_v26, %v1515_v4 }
 0x3af   : > { %1941 = vmatpush.msrb.mxu1 %v1916_v41 }
 0x3b0   : > { %v1728_v14 = vadd.f32 %v3376_v54, %v1707_v12  ;;  %v1521_v56 = vpop.f32.mrf.mxu1 }
 0x3b1   : > { %1942 = vmatpush.msrb.mxu1 %v1915_v57 }
 0x3b2   : > { %v1744_v30 = vmax.f32 %v1728_v14, 0.0 }
 0x3b4   : > { %1793 = vmatmul.f32.vlgmr.msrb.gmra.mxu0 %v1744_v30 }
 0x3b5   : > { %v1583_v17 = vpop.f32.mrf.mxu2  ;;  %v1662_v19 = vpop.f32.mrf.mxu3 }
 0x3b6   : > { %v1708_v23 = vadd.f32 %v1662_v19, %v1581_v16  ;;  %v1584_v29 = vadd.f32 %v1583_v17, %v1518_v6 }
 0x3b8   : > { %v1729_v58 = vadd.f32 %v3376_v54, %v1708_v23  ;;  %v1524_v31 = vpop.f32.mrf.mxu1 }
 0x3ba   : > { %v1745_v24 = vmax.f32 %v1729_v58, 0.0 }
 0x3bc   : > { %1796 = vmatmul.f32.gmra.mxu0 %v1745_v24 }
 0x3bd   : > { %v1586_v33 = vpop.f32.mrf.mxu2  ;;  %v1665_v62 = vpop.f32.mrf.mxu3 }
 0x3be   : > { %v1709_v3 = vadd.f32 %v1665_v62, %v1584_v29  ;;  %v1587_v42 = vadd.f32 %v1586_v33, %v1521_v56 }
 0x3c0   : > { %v1730_v36 = vadd.f32 %v3376_v54, %v1709_v3  ;;  %v1527_v38 = vpop.f32.mrf.mxu1 }
 0x3c2   : > { %v1746_v37 = vmax.f32 %v1730_v36, 0.0 }
 0x3c4   : > { %1799 = vmatmul.f32.gmra.mxu0 %v1746_v37 }
 0x3c5   : > { %v1589_v22 = vpop.f32.mrf.mxu2  ;;  %v1668_v47 = vpop.f32.mrf.mxu3 }
 0x3c6   : > { %v1710_v49 = vadd.f32 %v1668_v47, %v1587_v42  ;;  %v1590_v39 = vadd.f32 %v1589_v22, %v1524_v31 }
 0x3c8   : > { %v1731_v52 = vadd.f32 %v3376_v54, %v1710_v49  ;;  %v1530_v35 = vpop.f32.mrf.mxu1 }
 0x3ca   : > { %v1747_v55 = vmax.f32 %v1731_v52, 0.0 }
 0x3cc   : > { %1802 = vmatmul.f32.gmra.mxu0 %v1747_v55 }
 0x3cd   : > { %v1592_v60 = vpop.f32.mrf.mxu2  ;;  %v1671_v40 = vpop.f32.mrf.mxu3 }
 0x3ce   : > { %v1711_v61 = vadd.f32 %v1671_v40, %v1590_v39  ;;  %v1593_v2 = vadd.f32 %v1592_v60, %v1527_v38 }
 0x3d0   : > { %v1732_v21 = vadd.f32 %v3376_v54, %v1711_v61  ;;  %v1533_v0 = vpop.f32.mrf.mxu1 }
 0x3d2   : > { %v1748_v63 = vmax.f32 %v1732_v21, 0.0 }
 0x3d4   : > { %1805 = vmatmul.f32.gmra.mxu0 %v1748_v63 }
 0x3d5   : > { %v1595_v4 = vpop.f32.mrf.mxu2  ;;  %v1674_v5 = vpop.f32.mrf.mxu3 }
 0x3d6   : > { %v1712_v51 = vadd.f32 %v1674_v5, %v1593_v2  ;;  %v1596_v9 = vadd.f32 %v1595_v4, %v1530_v35 }
 0x3d8   : > { %v1733_v7 = vadd.f32 %v3376_v54, %v1712_v51  ;;  %v1536_v26 = vpop.f32.mrf.mxu1 }
 0x3da   : > { %v1749_v6 = vmax.f32 %v1733_v7, 0.0 }
 0x3dc   : > { %1808 = vmatmul.f32.gmra.mxu0 %v1749_v6 }
 0x3dd   : > { %v1598_v10 = vpop.f32.mrf.mxu2  ;;  %v1677_v12 = vpop.f32.mrf.mxu3 }
 0x3de   : > { %v1713_v14 = vadd.f32 %v1677_v12, %v1596_v9  ;;  %v1599_v16 = vadd.f32 %v1598_v10, %v1533_v0  ;;  %v1914_v0 = vld [vmem:[%s3509_s7 + $0x18] sm:$0xff] }
 0x3df   : > { %1943 = vmatpush.msrb.mxu1 %v1914_v0 }
 0x3e0   : > { %v1734_v56 = vadd.f32 %v3376_v54, %v1713_v14  ;;  %v1539_v58 = vpop.f32.mrf.mxu1 }
 0x3e1   : > { %1944 = vmatpush.msrb.mxu1 %v1913_v8 }
 0x3e2   : > { %v1750_v30 = vmax.f32 %v1734_v56, 0.0 }
 0x3e4   : > { %1811 = vmatmul.f32.gmra.mxu0 %v1750_v30 }
 0x3e5   : > { %v1601_v17 = vpop.f32.mrf.mxu2  ;;  %v1680_v19 = vpop.f32.mrf.mxu3 }
 0x3e6   : > { %v1714_v23 = vadd.f32 %v1680_v19, %v1599_v16  ;;  %v1602_v29 = vadd.f32 %v1601_v17, %v1536_v26  ;;  %v1912_v26 = vld [vmem:[%s3509_s7 + $0x8] sm:$0xff]  ;;  %v1911_v19 = vld [vmem:[%s3509_s7] sm:$0xff] }
 0x3e7   : > { %1945 = vmatpush.msrb.mxu1 %v1912_v26 }
 0x3e8   : > { %v1735_v31 = vadd.f32 %v3376_v54, %v1714_v23  ;;  %v1542_v38 = vpop.f32.mrf.mxu1 }
 0x3e9   : > { %1946 = vmatpush.msrb.mxu1 %v1911_v19 }
 0x3ea   : > { %v1751_v24 = vmax.f32 %v1735_v31, 0.0 }
 0x3ec   : > { %1814 = vmatmul.f32.gmra.mxu0 %v1751_v24 }
 0x3ed   : > { %v1604_v33 = vpop.f32.mrf.mxu2  ;;  %v1683_v62 = vpop.f32.mrf.mxu3 }
 0x3ee   : > { %v1715_v3 = vadd.f32 %v1683_v62, %v1602_v29  ;;  %v1605_v42 = vadd.f32 %v1604_v33, %v1539_v58 }
 0x3f0   : > { %v1736_v36 = vadd.f32 %v3376_v54, %v1715_v3  ;;  %v1545_v55 = vpop.f32.mrf.mxu1 }
 0x3f2   : > { %v1752_v37 = vmax.f32 %v1736_v36, 0.0 }
 0x3f4   : > { %1817 = vmatmul.f32.gmra.mxu0 %v1752_v37 }
 0x3f5   : > { %v1607_v22 = vpop.f32.mrf.mxu2  ;;  %v1686_v47 = vpop.f32.mrf.mxu3 }
 0x3f6   : > { %v1716_v49 = vadd.f32 %v1686_v47, %v1605_v42  ;;  %v1608_v39 = vadd.f32 %v1607_v22, %v1542_v38 }
 0x3f8   : > { %v1737_v52 = vadd.f32 %v3376_v54, %v1716_v49  ;;  %v1548_v2 = vpop.f32.mrf.mxu1 }
 0x3fa   : > { %v1753_v35 = vmax.f32 %v1737_v52, 0.0  ;;  %v3439_v52 = vld [vmem:[%s3508_s6 + $0x2] ss:$0 sm:$0xff] }
 0x3fc   : > { %1820 = vmatmul.f32.gmra.mxu0 %v1753_v35 }
 0x3fd   : > { %v1610_v60 = vpop.f32.mrf.mxu2  ;;  %v1689_v40 = vpop.f32.mrf.mxu3 }
 0x3fe   : > { %v1717_v61 = vadd.f32 %v1689_v40, %v1608_v39  ;;  %v1611_v46 = vadd.f32 %v1610_v60, %v1545_v55 }
 0x400   : > { %v1738_v21 = vadd.f32 %v3376_v54, %v1717_v61  ;;  %v1551_v56 = vpop.f32.mrf.mxu1 }
 0x402   : > { %v1754_v63 = vmax.f32 %v1738_v21, 0.0 }
 0x404   : > { %1823 = vmatmul.f32.gmra.mxu0 %v1754_v63 }
 0x405   : > { %v1613_v4 = vpop.f32.mrf.mxu2  ;;  %v1692_v5 = vpop.f32.mrf.mxu3 }
 0x406   : > { %v1718_v51 = vadd.f32 %v1692_v5, %v1611_v46  ;;  %v1614_v9 = vadd.f32 %v1613_v4, %v1548_v2 }
 0x408   : > { %v1739_v7 = vadd.f32 %v3376_v54, %v1718_v51  ;;  %v1554_v24 = vpop.f32.mrf.mxu1 }
 0x40a   : > { %v1755_v6 = vmax.f32 %v1739_v7, 0.0 }
 0x40c   : > { %1826 = vmatmul.f32.gmra.mxu0 %v1755_v6 }
 0x40d   : > { %v1616_v10 = vpop.f32.mrf.mxu2  ;;  %v1695_v12 = vpop.f32.mrf.mxu3 }
 0x40e   : > { %v1719_v14 = vadd.f32 %v1695_v12, %v1614_v9  ;;  %v1617_v16 = vadd.f32 %v1616_v10, %v1551_v56 }
 0x410   : > { %v1740_v30 = vadd.f32 %v3376_v54, %v1719_v14  ;;  %v1557_v37 = vpop.f32.mrf.mxu1 }
 0x412   : > { %v1756_v15 = vmax.f32 %v1740_v30, 0.0 }
 0x414   : > { %1829 = vmatmul.f32.gmra.mxu0 %v1756_v15 }
 0x415   : > { %v1698_v17 = vpop.f32.mrf.mxu3  ;;  %v1619_v58 = vpop.f32.mrf.mxu2 }
 0x416   : > { %v1720_v23 = vadd.f32 %v1698_v17, %v1617_v16  ;;  %v1620_v29 = vadd.f32 %v1619_v58, %v1554_v24 }
 0x418   : > { %v1741_v31 = vadd.f32 %v3376_v54, %v1720_v23 }
 0x41a   : > { %v1757_v28 = vmax.f32 %v1741_v31, 0.0 }
 0x41c   : > { %1832 = vmatmul.f32.gmra.mxu0 %v1757_v28 }
 0x41d   : > { %v1701_v33 = vpop.f32.mrf.mxu3  ;;  %v1622_v36 = vpop.f32.mrf.mxu2 }
 0x41e   : > { %v1721_v62 = vadd.f32 %v1701_v33, %v1620_v29  ;;  %v1623_v41 = vadd.f32 %v1622_v36, %v1557_v37 }
 0x420   : > { %v1742_v3 = vadd.f32 %v3376_v54, %v1721_v62 }
 0x422   : > { %v1758_v38 = vmax.f32 %v1742_v3, 0.0 }
 0x424   : > { %1835 = vmatmul.f32.gmra.mxu0 %v1758_v38 }
 0x425   : > { %v1704_v42 = vpop.f32.mrf.mxu3 }
 0x426   : > { %v1722_v22 = vadd.f32 %v1704_v42, %v1623_v41 }
 0x428   : > { %v1743_v47 = vadd.f32 %v3376_v54, %v1722_v22 }
 0x42a   : > { %v1759_v49 = vmax.f32 %v1743_v47, 0.0 }
 0x42c   : > { %1838 = vmatmul.f32.gmra.mxu0 %v1759_v49 }
 0x431   : > { %v1794_v35 = vpop.f32.mrf.mxu0 }
 0x432   : > { %v1842_v55 = vadd.f32 %v1794_v35, %v3228_v13 }
 0x434   : > { %v1863_v57 = vadd.f32 %v3439_v52, %v1842_v55 }
 0x436   : > { %1879 = vst [vmem:[#allocation2 + $0x8] sm:$0xff] %v1863_v57  ;;  %1947 = vmatmul.f32.vlgmr.msrb.gmra.mxu1 %v1863_v57 }
 0x439   : > { %v1797_v39 = vpop.f32.mrf.mxu0 }
 0x43a   : > { %v1843_v60 = vadd.f32 %v1797_v39, %v3237_v50 }
 0x43c   : > { %v1864_v40 = vadd.f32 %v3439_v52, %v1843_v60 }
 0x43e   : > { %1880 = vst [vmem:[#allocation2 + $0x10] sm:$0xff] %v1864_v40  ;;  %1950 = vmatmul.f32.gmra.mxu1 %v1864_v40 }
 0x441   : > { %v1800_v54 = vpop.f32.mrf.mxu0 }
 0x442   : > { %v1844_v61 = vadd.f32 %v1800_v54, %v3246_v59 }
 0x444   : > { %v1865_v21 = vadd.f32 %v3439_v52, %v1844_v61 }
 0x446   : > { %1881 = vst [vmem:[#allocation2 + $0x18] sm:$0xff] %v1865_v21  ;;  %1953 = vmatmul.f32.gmra.mxu1 %v1865_v21 }
 0x449   : > { %v1803_v63 = vpop.f32.mrf.mxu0 }
 0x44a   : > { %v1845_v13 = vadd.f32 %v1803_v63, %v3255_v45 }
 0x44c   : > { %v1866_v0 = vadd.f32 %v3439_v52, %v1845_v13 }
 0x44e   : > { %1882 = vst [vmem:[#allocation2 + $0x20] sm:$0xff] %v1866_v0  ;;  %1956 = vmatmul.f32.gmra.mxu1 %v1866_v0 }
 0x451   : > { %v1806_v46 = vpop.f32.mrf.mxu0 }
 0x452   : > { %v1846_v50 = vadd.f32 %v1806_v46, %v3264_v20 }
 0x454   : > { %v1867_v2 = vadd.f32 %v3439_v52, %v1846_v50 }
 0x456   : > { %1883 = vst [vmem:[#allocation2 + $0x28] sm:$0xff] %v1867_v2  ;;  %1959 = vmatmul.f32.gmra.mxu1 %v1867_v2 }
 0x459   : > { %v1809_v4 = vpop.f32.mrf.mxu0 }
 0x45a   : > { %v1847_v59 = vadd.f32 %v1809_v4, %v3273_v27 }
 0x45c   : > { %v1868_v5 = vadd.f32 %v3439_v52, %v1847_v59 }
 0x45e   : > { %1884 = vst [vmem:[#allocation2 + $0x30] sm:$0xff] %v1868_v5  ;;  %1962 = vmatmul.f32.gmra.mxu1 %v1868_v5 }
 0x461   : > { %v1812_v51 = vpop.f32.mrf.mxu0 }
 0x462   : > { %v1848_v45 = vadd.f32 %v1812_v51, %v3282_v34 }
 0x464   : > { %v1869_v7 = vadd.f32 %v3439_v52, %v1848_v45 }
 0x466   : > { %1885 = vst [vmem:[#allocation2 + $0x38] sm:$0xff] %v1869_v7  ;;  %1965 = vmatmul.f32.gmra.mxu1 %v1869_v7 }
 0x469   : > { %v1815_v6 = vpop.f32.mrf.mxu0 }
 0x46a   : > { %v1849_v20 = vadd.f32 %v1815_v6, %v3291_v43 }
 0x46c   : > { %v1870_v8 = vadd.f32 %v3439_v52, %v1849_v20 }
 0x46e   : > { %1886 = vst [vmem:[#allocation2 + $0x40] sm:$0xff] %v1870_v8  ;;  %1968 = vmatmul.f32.gmra.mxu1 %v1870_v8 }
 0x471   : > { %v1818_v9 = vpop.f32.mrf.mxu0 }
 0x472   : > { %v1850_v27 = vadd.f32 %v1818_v9, %v3300_v48 }
 0x474   : > { %v1871_v26 = vadd.f32 %v3439_v52, %v1850_v27 }
 0x476   : > { %1887 = vst [vmem:[#allocation2 + $0x48] sm:$0xff] %v1871_v26  ;;  %1971 = vmatmul.f32.gmra.mxu1 %v1871_v26 }
 0x479   : > { %v1821_v10 = vpop.f32.mrf.mxu0 }
 0x47a   : > { %v1851_v34 = vadd.f32 %v1821_v10, %v3309_v53 }
 0x47c   : > { %v1872_v12 = vadd.f32 %v3439_v52, %v1851_v34 }
 0x47e   : > { %1888 = vst [vmem:[#allocation2 + $0x50] sm:$0xff] %v1872_v12  ;;  %1974 = vmatmul.f32.gmra.mxu1 %v1872_v12 }
 0x481   : > { %v1824_v14 = vpop.f32.mrf.mxu0 }
 0x482   : > { %v1852_v43 = vadd.f32 %v1824_v14, %v3318_v11 }
 0x484   : > { %v1873_v56 = vadd.f32 %v3439_v52, %v1852_v43 }
 0x486   : > { %1889 = vst [vmem:[#allocation2 + $0x58] sm:$0xff] %v1873_v56  ;;  %1977 = vmatmul.f32.gmra.mxu1 %v1873_v56 }
 0x489   : > { %v1827_v30 = vpop.f32.mrf.mxu0 }
 0x48a   : > { %v1853_v48 = vadd.f32 %v1827_v30, %v3327_v18 }
 0x48c   : > { %v1874_v15 = vadd.f32 %v3439_v52, %v1853_v48 }
 0x48e   : > { %1890 = vst [vmem:[#allocation2 + $0x60] sm:$0xff] %v1874_v15  ;;  %1980 = vmatmul.f32.gmra.mxu1 %v1874_v15 }
 0x491   : > { %v1830_v16 = vpop.f32.mrf.mxu0 }
 0x492   : > { %v1854_v53 = vadd.f32 %v1830_v16, %v3336_v25 }
 0x494   : > { %v1875_v17 = vadd.f32 %v3439_v52, %v1854_v53 }
 0x496   : > { %1891 = vst [vmem:[#allocation2 + $0x68] sm:$0xff] %v1875_v17  ;;  %1983 = vmatmul.f32.gmra.mxu1 %v1875_v17 }
 0x499   : > { %v1833_v19 = vpop.f32.mrf.mxu0 }
 0x49a   : > { %v1855_v11 = vadd.f32 %v1833_v19, %v3345_v32  ;;  %v2292_v32 = vld [vmem:[%s3510_s8] ss:$0 sm:$0xff] }
 0x49c   : > { %v1876_v23 = vadd.f32 %v3439_v52, %v1855_v11 }
 0x49e   : > { %1892 = vst [vmem:[#allocation2 + $0x70] sm:$0xff] %v1876_v23  ;;  %1986 = vmatmul.f32.gmra.mxu1 %v1876_v23 }
 0x4a1   : > { %v1836_v18 = vpop.f32.mrf.mxu0 }
 0x4a2   : > { %v1856_v58 = vadd.f32 %v1836_v18, %v3357_v44 }
 0x4a4   : > { %v1877_v31 = vadd.f32 %v3439_v52, %v1856_v58 }
 0x4a6   : > { %1893 = vst [vmem:[#allocation2 + $0x78] sm:$0xff] %v1877_v31  ;;  %1989 = vmatmul.f32.gmra.mxu1 %v1877_v31 }
 0x4a9   : > { %v1839_v25 = vpop.f32.mrf.mxu0 }
 0x4aa   : > { %v1857_v24 = vadd.f32 %v1839_v25, %v3363_v1 }
 0x4ac   : > { %v1878_v28 = vadd.f32 %v3439_v52, %v1857_v24 }
 0x4ae   : > { %1894 = vst [vmem:[#allocation2 + $0x80] sm:$0xff] %v1878_v28  ;;  %1992 = vmatmul.f32.gmra.mxu1 %v1878_v28 }
 0x4b3   : > { %v1948_v44 = vpop.f32.mrf.mxu1 }
 0x4b4   : > { %v1949_v1 = vadd.f32 %v2292_v32, %v1948_v44 }
 0x4b6   : > { %1996 = vst [vmem:[%s3481_s13] sm:$0xff] %v1949_v1 }
 0x4bb   : > { %v1951_v29 = vpop.f32.mrf.mxu1 }
 0x4bc   : > { %v1952_v33 = vadd.f32 %v2292_v32, %v1951_v29 }
 0x4be   : > { %1997 = vst [vmem:[%s3481_s13 + $0x8] sm:$0xff] %v1952_v33 }
 0x4c3   : > { %v1954_v62 = vpop.f32.mrf.mxu1 }
 0x4c4   : > { %v1955_v3 = vadd.f32 %v2292_v32, %v1954_v62 }
 0x4c6   : > { %1998 = vst [vmem:[%s3481_s13 + $0x10] sm:$0xff] %v1955_v3 }
 0x4cb   : > { %v1957_v36 = vpop.f32.mrf.mxu1 }
 0x4cc   : > { %v1958_v38 = vadd.f32 %v2292_v32, %v1957_v36 }
 0x4ce   : > { %1999 = vst [vmem:[%s3481_s13 + $0x18] sm:$0xff] %v1958_v38 }
 0x4d3   : > { %v1960_v37 = vpop.f32.mrf.mxu1 }
 0x4d4   : > { %v1961_v41 = vadd.f32 %v2292_v32, %v1960_v37 }
 0x4d6   : > { %2000 = vst [vmem:[%s3481_s13 + $0x20] sm:$0xff] %v1961_v41 }
 0x4db   : > { %v1963_v42 = vpop.f32.mrf.mxu1 }
 0x4dc   : > { %v1964_v22 = vadd.f32 %v2292_v32, %v1963_v42 }
 0x4de   : > { %2001 = vst [vmem:[%s3481_s13 + $0x28] sm:$0xff] %v1964_v22 }
 0x4e3   : > { %v1966_v47 = vpop.f32.mrf.mxu1 }
 0x4e4   : > { %v1967_v49 = vadd.f32 %v2292_v32, %v1966_v47 }
 0x4e6   : > { %2002 = vst [vmem:[%s3481_s13 + $0x30] sm:$0xff] %v1967_v49 }
 0x4eb   : > { %v1969_v52 = vpop.f32.mrf.mxu1 }
 0x4ec   : > { %v1970_v35 = vadd.f32 %v2292_v32, %v1969_v52 }
 0x4ee   : > { %2003 = vst [vmem:[%s3481_s13 + $0x38] sm:$0xff] %v1970_v35 }
 0x4f3   : > { %v1972_v55 = vpop.f32.mrf.mxu1 }
 0x4f4   : > { %v1973_v57 = vadd.f32 %v2292_v32, %v1972_v55 }
 0x4f6   : > { %2004 = vst [vmem:[%s3481_s13 + $0x40] sm:$0xff] %v1973_v57 }
 0x4fb   : > { %v1975_v39 = vpop.f32.mrf.mxu1 }
 0x4fc   : > { %v1976_v60 = vadd.f32 %v2292_v32, %v1975_v39 }
 0x4fe   : > { %2005 = vst [vmem:[%s3481_s13 + $0x48] sm:$0xff] %v1976_v60 }
 0x503   : > { %v1978_v40 = vpop.f32.mrf.mxu1 }
 0x504   : > { %v1979_v54 = vadd.f32 %v2292_v32, %v1978_v40 }
 0x506   : > { %2006 = vst [vmem:[%s3481_s13 + $0x50] sm:$0xff] %v1979_v54 }
 0x50b   : > { %v1981_v61 = vpop.f32.mrf.mxu1 }
 0x50c   : > { %v1982_v21 = vadd.f32 %v2292_v32, %v1981_v61 }
 0x50e   : > { %2007 = vst [vmem:[%s3481_s13 + $0x58] sm:$0xff] %v1982_v21 }
 0x513   : > { %v1984_v63 = vpop.f32.mrf.mxu1 }
 0x514   : > { %v1985_v13 = vadd.f32 %v2292_v32, %v1984_v63 }
 0x516   : > { %2008 = vst [vmem:[%s3481_s13 + $0x60] sm:$0xff] %v1985_v13 }
 0x51b   : > { %v1987_v0 = vpop.f32.mrf.mxu1 }
 0x51c   : > { %v1988_v46 = vadd.f32 %v2292_v32, %v1987_v0 }
 0x51e   : > { %2009 = vst [vmem:[%s3481_s13 + $0x68] sm:$0xff] %v1988_v46 }
 0x523   : > { %v1990_v50 = vpop.f32.mrf.mxu1 }
 0x524   : > { %v1991_v2 = vadd.f32 %v2292_v32, %v1990_v50 }
 0x526   : > { %2010 = vst [vmem:[%s3481_s13 + $0x70] sm:$0xff] %v1991_v2 }
 0x52b   : > { %v1993_v4 = vpop.f32.mrf.mxu1 }
 0x52c   : > { %v1994_v59 = vadd.f32 %v2292_v32, %v1993_v4 }
 0x52e   : > { %2011 = vst [vmem:[%s3481_s13 + $0x78] sm:$0xff] %v1994_v59 }
 0x52f PF: > { %s19_s30 = sadd.s32 1, %s2299_s30  }
 0x530   : > { %p16_p4 = scmp.ge.s32.totalorder %s19_s30, 4  }
 0x532   :  { %18 = sbr.rel (!%p16_p4) target bundleno = 1 (0x1), region = 100 }

</bundles_post_ra>
